<compile_context>
chip_gen: v6e
topology: v6e:2x2x1
jax: 0.10.0
libtpu: 0.0.40
codegen_flags: <defaults>
</compile_context>

<pallas_src>
import numpy as np
import jax
import jax.numpy as jnp
from jax import lax
from jax.experimental import pallas as pl
from jax.experimental.pallas import tpu as pltpu

EPS = 1e-5


def _derive_vmem_limit():
    """~3/4 of the chip's VMEM (v5e/v6e ~96 MiB, v7x ~48 MiB); safe fallback."""
    try:
        cap = getattr(pltpu.get_tpu_info(), "vmem_capacity_bytes", 0)
        if cap:
            return int(cap) * 3 // 4
    except Exception:
        pass
    return 48 * 1024 * 1024


VMEM_LIMIT = _derive_vmem_limit()


def _bn_affine(s_part, q_part, count, gamma, beta, parities):
    """Per-grid-step partial (sum, sumsq) -> per-channel BN affine (scale, shift).

    Training-mode BatchNorm (biased variance).  parities > 1 pools the stats of the
    parity-blocked channel groups of the 2x-upsampled map and re-tiles the affine so
    it applies directly to the parity-blocked (parities*C, HW) layout.
    """
    c = gamma.shape[0]
    s = jnp.sum(s_part, axis=0)[:, 0].reshape(parities, c).sum(axis=0)
    q = jnp.sum(q_part, axis=0)[:, 0].reshape(parities, c).sum(axis=0)
    mean = s / count
    # TODO(synk): single-pass E[x^2]-E[x]^2 can cancel for huge counts with large
    # |mean|; switch to mean-shifted accumulation if that regime matters.
    var = jnp.maximum(q / count - mean * mean, 0.0)
    scale = gamma * lax.rsqrt(var + EPS)
    shift = beta - mean * scale
    return (jnp.tile(scale, parities).reshape(parities * c, 1),
            jnp.tile(shift, parities).reshape(parities * c, 1))


# ---------------------------------------------------------------------------
# Decoder block forward (Pallas).
# ---------------------------------------------------------------------------
def decoder_block(x_nchw, p):
    N, m, H, W = x_nchw.shape
    assert m % 4 == 0
    m4 = m // 4
    n_out = p['w3'].shape[1]
    HW = H * W
    # Images per grid step (amortizes per-step overhead).  TODO(synk): derive from the
    # per-chip VMEM budget and add H-row tiling with a 1-row halo for very large maps.
    B_TILE = 2 if N % 2 == 0 else 1
    G = N // B_TILE
    cnt1 = float(N * HW)            # BN1 element count per channel
    cnt2 = float(4 * N * HW)        # BN2 / BN3 count on the 2x-upsampled map

    # Channels-on-sublanes / HW-on-lanes layout: NCHW is already (N, C, H*W).
    x = x_nchw.reshape(N, m, HW)

    # ---- weights in transposed (out, in) form -------------------------------------
    w1t = jnp.transpose(p['w1'], (1, 0))                       # (m4, m)
    w2t = jnp.transpose(p['w2'], (0, 2, 1))                    # (9, co, ci)
    z = jnp.zeros((m4, m4), jnp.float32)
    # One (4*m4, m4) weight per spatial tap [h(i,j), h(i,j+1), h(i+1,j), h(i+1,j+1)];
    # row blocks are the output parities [ee, eo, oe, oo] of out[2i+di, 2j+dj].
    wtap = jnp.stack([
        jnp.concatenate([w2t[4], w2t[5], w2t[7], w2t[8]], axis=0),
        jnp.concatenate([z,      w2t[3], z,      w2t[6]], axis=0),
        jnp.concatenate([z,      z,      w2t[1], w2t[2]], axis=0),
        jnp.concatenate([z,      z,      z,      w2t[0]], axis=0),
    ])                                                         # (4, 4*m4, m4)
    w3t = jnp.transpose(p['w3'], (1, 0))                       # (n, m4)
    zn = jnp.zeros((n_out, m4), jnp.float32)
    w3bt = jnp.concatenate(
        [jnp.concatenate([w3t if j == i else zn for j in range(4)], axis=1)
         for i in range(4)], axis=0)                           # (4n, 4m4) block-diag
    # TODO(synk): cast activations/weights to bf16 (keep preferred_element_type=f32)
    # for the v6e/v7x MXU once re-validated against the accuracy tolerance.

    cp = pltpu.CompilerParams(dimension_semantics=("parallel",),
                              vmem_limit_bytes=VMEM_LIMIT)

    def img_spec(c):
        return pl.BlockSpec((B_TILE, c, HW), lambda g: (g, 0, 0))

    def const_spec(shape):
        nd = len(shape)
        return pl.BlockSpec(shape, lambda g: (0,) * nd)

    def stat_spec(c):
        return pl.BlockSpec((1, c, 1), lambda g: (g, 0, 0))

    def stat_shape(c):
        return jax.ShapeDtypeStruct((G, c, 1), jnp.float32)

    # ---- phase 1: conv1 (1x1) + partial BN1 stats ----------------------------------
    def conv1_kernel(x_ref, w1t_ref, h_ref, s_ref, q_ref):
        w = w1t_ref[...]
        s = jnp.zeros((m4, 1), jnp.float32)
        q = jnp.zeros((m4, 1), jnp.float32)
        for b in range(B_TILE):                       # static unroll over images
            h = jnp.dot(w, x_ref[b], preferred_element_type=jnp.float32)
            h_ref[b] = h
            s = s + jnp.sum(h, axis=-1, keepdims=True)
            q = q + jnp.sum(h * h, axis=-1, keepdims=True)
        s_ref[...] = s.reshape(1, m4, 1)
        q_ref[...] = q.reshape(1, m4, 1)

    h_lin, s1p, q1p = pl.pallas_call(
        conv1_kernel, grid=(G,),
        in_specs=[img_spec(m), const_spec((m4, m))],
        out_specs=(img_spec(m4), stat_spec(m4), stat_spec(m4)),
        out_shape=(jax.ShapeDtypeStruct((N, m4, HW), jnp.float32),
                   stat_shape(m4), stat_shape(m4)),
        compiler_params=cp,
    )(x, w1t)
    sc1, sh1 = _bn_affine(s1p, q1p, cnt1, p['g1'], p['be1'], 1)

    # ---- phase 2: BN1+ReLU -> 9-tap transposed conv + partial BN2 stats ------------
    def deconv_kernel(h_ref, wt_ref, sc_ref, sh_ref, d_ref, s_ref, q_ref):
        wt = wt_ref[...]
        sc, sh = sc_ref[...], sh_ref[...]
        lane = lax.broadcasted_iota(jnp.int32, (1, HW), 1)
        col_ok = (lane % W) != (W - 1)        # source column j+1 stays inside the row
        row_ok = lane < (H - 1) * W           # source row i+1 stays inside the image
        both_ok = col_ok & row_ok
        s = jnp.zeros((4 * m4, 1), jnp.float32)
        q = jnp.zeros((4 * m4, 1), jnp.float32)
        for b in range(B_TILE):
            h = jnp.maximum(h_ref[b] * sc + sh, 0.0)
            # Shifted taps on the flat lane axis: rotate left by 1 / W / W+1
            # (positive shift HW-delta == jnp.roll by -delta) and zero positions
            # whose source falls off the image edge.
            h_w = jnp.where(col_ok, pltpu.roll(h, HW - 1, axis=1), 0.0)
            h_h = jnp.where(row_ok, pltpu.roll(h, HW - W, axis=1), 0.0)
            h_hw = jnp.where(both_ok, pltpu.roll(h, HW - W - 1, axis=1), 0.0)
            d = jnp.dot(wt[0], h, preferred_element_type=jnp.float32)
            d = d + jnp.dot(wt[1], h_w, preferred_element_type=jnp.float32)
            d = d + jnp.dot(wt[2], h_h, preferred_element_type=jnp.float32)
            d = d + jnp.dot(wt[3], h_hw, preferred_element_type=jnp.float32)
            d_ref[b] = d
            s = s + jnp.sum(d, axis=-1, keepdims=True)
            q = q + jnp.sum(d * d, axis=-1, keepdims=True)
        s_ref[...] = s.reshape(1, 4 * m4, 1)
        q_ref[...] = q.reshape(1, 4 * m4, 1)

    d_lin, s2p, q2p = pl.pallas_call(
        deconv_kernel, grid=(G,),
        in_specs=[img_spec(m4), const_spec((4, 4 * m4, m4)),
                  const_spec((m4, 1)), const_spec((m4, 1))],
        out_specs=(img_spec(4 * m4), stat_spec(4 * m4), stat_spec(4 * m4)),
        out_shape=(jax.ShapeDtypeStruct((N, 4 * m4, HW), jnp.float32),
                   stat_shape(4 * m4), stat_shape(4 * m4)),
        compiler_params=cp,
    )(h_lin, wtap, sc1, sh1)
    sc2, sh2 = _bn_affine(s2p, q2p, cnt2, p['g2'], p['be2'], 4)

    # ---- phase 3: BN2+ReLU -> conv3 (1x1, block-diagonal over parities) ------------
    def conv3_kernel(d_ref, w3_ref, sc_ref, sh_ref, c_ref, s_ref, q_ref):
        w = w3_ref[...]
        sc, sh = sc_ref[...], sh_ref[...]
        s = jnp.zeros((4 * n_out, 1), jnp.float32)
        q = jnp.zeros((4 * n_out, 1), jnp.float32)
        for b in range(B_TILE):
            d = jnp.maximum(d_ref[b] * sc + sh, 0.0)
            c = jnp.dot(w, d, preferred_element_type=jnp.float32)
            c_ref[b] = c
            s = s + jnp.sum(c, axis=-1, keepdims=True)
            q = q + jnp.sum(c * c, axis=-1, keepdims=True)
        s_ref[...] = s.reshape(1, 4 * n_out, 1)
        q_ref[...] = q.reshape(1, 4 * n_out, 1)

    c_lin, s3p, q3p = pl.pallas_call(
        conv3_kernel, grid=(G,),
        in_specs=[img_spec(4 * m4), const_spec((4 * n_out, 4 * m4)),
                  const_spec((4 * m4, 1)), const_spec((4 * m4, 1))],
        out_specs=(img_spec(4 * n_out), stat_spec(4 * n_out), stat_spec(4 * n_out)),
        out_shape=(jax.ShapeDtypeStruct((N, 4 * n_out, HW), jnp.float32),
                   stat_shape(4 * n_out), stat_shape(4 * n_out)),
        compiler_params=cp,
    )(d_lin, w3bt, sc2, sh2)
    sc3, sh3 = _bn_affine(s3p, q3p, cnt2, p['g3'], p['be3'], 4)

    # ---- phase 4: final BN3 + ReLU (pure elementwise, lane-dense in/out) -----------
    def bn3_kernel(c_ref, sc_ref, sh_ref, y_ref):
        y_ref[...] = jnp.maximum(c_ref[...] * sc_ref[...] + sh_ref[...], 0.0)

    y_packed = pl.pallas_call(
        bn3_kernel, grid=(G,),
        in_specs=[img_spec(4 * n_out), const_spec((4 * n_out, 1)),
                  const_spec((4 * n_out, 1))],
        out_specs=img_spec(4 * n_out),
        out_shape=jax.ShapeDtypeStruct((N, 4 * n_out, HW), jnp.float32),
        compiler_params=cp,
    )(c_lin, sc3, sh3)

    # Unpack parity blocks (ee, eo, oe, oo) into the 2x-upsampled map, back to NCHW.
    y = y_packed.reshape(N, 2, 2, n_out, H, W)
    return jnp.transpose(y, (0, 3, 4, 1, 5, 2)).reshape(N, n_out, 2 * H, 2 * W)


# ---------------------------------------------------------------------------
# Deterministic parameter init (shapes from DecoderBlock.__init__)
# ---------------------------------------------------------------------------
def init_params(key, m, n):
    m4 = m // 4
    ks = jax.random.split(key, 6)
    w1 = jax.random.normal(ks[0], (m, m4), jnp.float32) / np.sqrt(m)          # conv1 (Cin x Cout)
    b1 = 0.1 * jax.random.normal(ks[1], (m4,), jnp.float32)
    w2_pt = jax.random.normal(ks[2], (m4, m4, 3, 3), jnp.float32) / np.sqrt(9 * m4)  # (Cin, Cout, kH, kW)
    b2 = 0.1 * jax.random.normal(ks[3], (m4,), jnp.float32)
    w3 = jax.random.normal(ks[4], (m4, n), jnp.float32) / np.sqrt(m4)         # conv3 (Cin x Cout)
    b3 = 0.1 * jax.random.normal(ks[5], (n,), jnp.float32)
    return dict(
        w1=w1, b1=b1,
        w2=jnp.transpose(w2_pt, (2, 3, 0, 1)).reshape(9, m4, m4), w2_pt=w2_pt, b2=b2,
        w3=w3, b3=b3,
        g1=jnp.ones((m4,), jnp.float32), be1=jnp.zeros((m4,), jnp.float32),
        g2=jnp.ones((m4,), jnp.float32), be2=jnp.zeros((m4,), jnp.float32),
        g3=jnp.ones((n,), jnp.float32), be3=jnp.zeros((n,), jnp.float32),
    )


# Pure-JAX reference (NCHW, lax convolutions, biases included) to validate the kernels.
def reference(x, p):
    dn = ('NCHW', 'OIHW', 'NCHW')
    hp = lax.Precision.HIGHEST

    def bn(t, g, b):
        mean = jnp.mean(t, axis=(0, 2, 3), keepdims=True)
        var = jnp.mean((t - mean) ** 2, axis=(0, 2, 3), keepdims=True)
        return (t - mean) * lax.rsqrt(var + EPS) * g.reshape(1, -1, 1, 1) + b.reshape(1, -1, 1, 1)

    w1_oihw = jnp.transpose(p['w1'], (1, 0))[:, :, None, None]
    h = lax.conv_general_dilated(x, w1_oihw, (1, 1), 'VALID',
                                 dimension_numbers=dn, precision=hp) + p['b1'].reshape(1, -1, 1, 1)
    h = jax.nn.relu(bn(h, p['g1'], p['be1']))

    # ConvTranspose2d(3, stride=2, padding=1, output_padding=1) as a dilated conv
    w2p = jnp.transpose(p['w2_pt'], (1, 0, 2, 3))[:, :, ::-1, ::-1]
    h = lax.conv_general_dilated(h, w2p, (1, 1), ((1, 2), (1, 2)), lhs_dilation=(2, 2),
                                 dimension_numbers=dn, precision=hp) + p['b2'].reshape(1, -1, 1, 1)
    h = jax.nn.relu(bn(h, p['g2'], p['be2']))

    w3_oihw = jnp.transpose(p['w3'], (1, 0))[:, :, None, None]
    h = lax.conv_general_dilated(h, w3_oihw, (1, 1), 'VALID',
                                 dimension_numbers=dn, precision=hp) + p['b3'].reshape(1, -1, 1, 1)
    return jax.nn.relu(bn(h, p['g3'], p['be3']))


if __name__ == "__main__":
    key = jax.random.PRNGKey(0)
    kx, kp = jax.random.split(key)
    N, m, H, W, n = 2, 8, 16, 16, 4          # DecoderBlock(m=8, n=4), x: (2, 8, 16, 16)
    x = jax.random.normal(kx, (N, m, H, W), jnp.float32)
    params = init_params(kp, m, n)

    fwd = jax.jit(decoder_block)
    y = jax.block_until_ready(fwd(x, params))
    y_ref = jax.block_until_ready(reference(x, params))

    assert y.shape == (N, n, 2 * H, 2 * W), y.shape
    np.testing.assert_allclose(np.asarray(y), np.asarray(y_ref), atol=1e-2, rtol=1e-2)
    print("KERNEL_OK")
</pallas_src>

<mosaic_0001>
module attributes {stable_mosaic.version = 11 : i64} {
  func.func @conv1_kernel(%arg0: i32, %arg1: memref<2x8x256xf32, #tpu.memory_space<vmem>>, %arg2: memref<2x8xf32, #tpu.memory_space<vmem>>, %arg3: memref<2x2x256xf32, #tpu.memory_space<vmem>>, %arg4: memref<1x2x1xf32, #tpu.memory_space<vmem>>, %arg5: memref<1x2x1xf32, #tpu.memory_space<vmem>>) attributes {dimension_semantics = [#tpu.dimension_semantics<parallel>], iteration_bounds = array<i64: 1>, scalar_prefetch = 0 : i64, scratch_operands = 0 : i64, tpu.core_type = #tpu.core_type<tc>, window_params = [{transform_indices = @transform_0, window_bounds = array<i64: 2, 8, 256>}, {pipeline_mode = #tpu.pipeline_mode<synchronous>, transform_indices = @transform_1, window_bounds = array<i64: 2, 8>}, {transform_indices = @transform_2, window_bounds = array<i64: 2, 2, 256>}, {transform_indices = @transform_3, window_bounds = array<i64: 1, 2, 1>}, {transform_indices = @transform_4, window_bounds = array<i64: 1, 2, 1>}]} {
    %c0 = arith.constant 0 : index
    %c0_0 = arith.constant 0 : index
    %0 = vector.load %arg2[%c0, %c0_0] : memref<2x8xf32, #tpu.memory_space<vmem>>, vector<2x8xf32>
    %cst = arith.constant 0.000000e+00 : f32
    %1 = vector.broadcast %cst : f32 to vector<2x1xf32>
    %cst_1 = arith.constant 0.000000e+00 : f32
    %2 = vector.broadcast %cst_1 : f32 to vector<2x1xf32>
    %c0_2 = arith.constant 0 : index
    %c0_3 = arith.constant 0 : index
    %c0_4 = arith.constant 0 : index
    %3 = vector.load %arg1[%c0_2, %c0_3, %c0_4] : memref<2x8x256xf32, #tpu.memory_space<vmem>>, vector<1x8x256xf32>
    %4 = vector.shape_cast %3 : vector<1x8x256xf32> to vector<8x256xf32>
    %cst_5 = arith.constant dense<0.000000e+00> : vector<2x256xf32>
    %5 = tpu.matmul %0, %4, %cst_5 {dimension_numbers = #tpu.dot_dimension_numbers<[1], [0], [0], [1], [0, 0, 1, 1], [], []>} : vector<2x8xf32>, vector<8x256xf32>, vector<2x256xf32> -> vector<2x256xf32>
    %c0_6 = arith.constant 0 : index
    %c0_7 = arith.constant 0 : index
    %c0_8 = arith.constant 0 : index
    %6 = vector.load %arg3[%c0_6, %c0_7, %c0_8] : memref<2x2x256xf32, #tpu.memory_space<vmem>>, vector<1x2x256xf32>
    %7 = vector.shape_cast %6 : vector<1x2x256xf32> to vector<2x256xf32>
    %8 = vector.shape_cast %5 : vector<2x256xf32> to vector<1x2x256xf32>
    tpu.vector_store %arg3[%c0_6, %c0_7, %c0_8], %8 {strides = array<i32>} : memref<2x2x256xf32, #tpu.memory_space<vmem>>, vector<1x2x256xf32>,
    %cst_9 = arith.constant dense<0.000000e+00> : vector<2xf32>
    %9 = vector.multi_reduction <add>, %5, %cst_9 [1] : vector<2x256xf32> to vector<2xf32>
    %10 = vector.shape_cast %9 : vector<2xf32> to vector<2x1xf32>
    %11 = arith.addf %1, %10 : vector<2x1xf32>
    %12 = arith.mulf %5, %5 : vector<2x256xf32>
    %cst_10 = arith.constant dense<0.000000e+00> : vector<2xf32>
    %13 = vector.multi_reduction <add>, %12, %cst_10 [1] : vector<2x256xf32> to vector<2xf32>
    %14 = vector.shape_cast %13 : vector<2xf32> to vector<2x1xf32>
    %15 = arith.addf %2, %14 : vector<2x1xf32>
    %c1 = arith.constant 1 : index
    %c0_11 = arith.constant 0 : index
    %c0_12 = arith.constant 0 : index
    %16 = vector.load %arg1[%c1, %c0_11, %c0_12] : memref<2x8x256xf32, #tpu.memory_space<vmem>>, vector<1x8x256xf32>
    %17 = vector.shape_cast %16 : vector<1x8x256xf32> to vector<8x256xf32>
    %cst_13 = arith.constant dense<0.000000e+00> : vector<2x256xf32>
    %18 = tpu.matmul %0, %17, %cst_13 {dimension_numbers = #tpu.dot_dimension_numbers<[1], [0], [0], [1], [0, 0, 1, 1], [], []>} : vector<2x8xf32>, vector<8x256xf32>, vector<2x256xf32> -> vector<2x256xf32>
    %c1_14 = arith.constant 1 : index
    %c0_15 = arith.constant 0 : index
    %c0_16 = arith.constant 0 : index
    %19 = vector.load %arg3[%c1_14, %c0_15, %c0_16] : memref<2x2x256xf32, #tpu.memory_space<vmem>>, vector<1x2x256xf32>
    %20 = vector.shape_cast %19 : vector<1x2x256xf32> to vector<2x256xf32>
    %21 = vector.shape_cast %18 : vector<2x256xf32> to vector<1x2x256xf32>
    tpu.vector_store %arg3[%c1_14, %c0_15, %c0_16], %21 {strides = array<i32>} : memref<2x2x256xf32, #tpu.memory_space<vmem>>, vector<1x2x256xf32>,
    %cst_17 = arith.constant dense<0.000000e+00> : vector<2xf32>
    %22 = vector.multi_reduction <add>, %18, %cst_17 [1] : vector<2x256xf32> to vector<2xf32>
    %23 = vector.shape_cast %22 : vector<2xf32> to vector<2x1xf32>
    %24 = arith.addf %11, %23 : vector<2x1xf32>
    %25 = arith.mulf %18, %18 : vector<2x256xf32>
    %cst_18 = arith.constant dense<0.000000e+00> : vector<2xf32>
    %26 = vector.multi_reduction <add>, %25, %cst_18 [1] : vector<2x256xf32> to vector<2xf32>
    %27 = vector.shape_cast %26 : vector<2xf32> to vector<2x1xf32>
    %28 = arith.addf %15, %27 : vector<2x1xf32>
    %29 = vector.shape_cast %24 : vector<2x1xf32> to vector<1x2x1xf32>
    %c0_19 = arith.constant 0 : index
    %c0_20 = arith.constant 0 : index
    %c0_21 = arith.constant 0 : index
    %30 = vector.load %arg4[%c0_19, %c0_20, %c0_21] : memref<1x2x1xf32, #tpu.memory_space<vmem>>, vector<1x2x1xf32>
    tpu.vector_store %arg4[%c0_19, %c0_20, %c0_21], %29 {strides = array<i32>} : memref<1x2x1xf32, #tpu.memory_space<vmem>>, vector<1x2x1xf32>,
    %31 = vector.shape_cast %28 : vector<2x1xf32> to vector<1x2x1xf32>
    %c0_22 = arith.constant 0 : index
    %c0_23 = arith.constant 0 : index
    %c0_24 = arith.constant 0 : index
    %32 = vector.load %arg5[%c0_22, %c0_23, %c0_24] : memref<1x2x1xf32, #tpu.memory_space<vmem>>, vector<1x2x1xf32>
    tpu.vector_store %arg5[%c0_22, %c0_23, %c0_24], %31 {strides = array<i32>} : memref<1x2x1xf32, #tpu.memory_space<vmem>>, vector<1x2x1xf32>,
    return
  }
  func.func @transform_0(%arg0: i32) -> (i32, i32, i32) {
    %c0_i32 = arith.constant 0 : i32
    %c0_i32_0 = arith.constant 0 : i32
    %c0_i32_1 = arith.constant 0 : i32
    return %arg0, %c0_i32, %c0_i32_0 : i32, i32, i32
  }
  func.func @transform_1(%arg0: i32) -> (i32, i32) {
    %c0_i32 = arith.constant 0 : i32
    %c0_i32_0 = arith.constant 0 : i32
    %c0_i32_1 = arith.constant 0 : i32
    return %c0_i32, %c0_i32_0 : i32, i32
  }
  func.func @transform_2(%arg0: i32) -> (i32, i32, i32) {
    %c0_i32 = arith.constant 0 : i32
    %c0_i32_0 = arith.constant 0 : i32
    %c0_i32_1 = arith.constant 0 : i32
    return %arg0, %c0_i32, %c0_i32_0 : i32, i32, i32
  }
  func.func @transform_3(%arg0: i32) -> (i32, i32, i32) {
    %c0_i32 = arith.constant 0 : i32
    %c0_i32_0 = arith.constant 0 : i32
    %c0_i32_1 = arith.constant 0 : i32
    return %arg0, %c0_i32, %c0_i32_0 : i32, i32, i32
  }
  func.func @transform_4(%arg0: i32) -> (i32, i32, i32) {
    %c0_i32 = arith.constant 0 : i32
    %c0_i32_0 = arith.constant 0 : i32
    %c0_i32_1 = arith.constant 0 : i32
    return %arg0, %c0_i32, %c0_i32_0 : i32, i32, i32
  }
}

module attributes {stable_mosaic.version = 11 : i64} {
  func.func @deconv_kernel(%arg0: i32, %arg1: memref<2x2x256xf32, #tpu.memory_space<vmem>>, %arg2: memref<4x8x2xf32, #tpu.memory_space<vmem>>, %arg3: memref<2x1xf32, #tpu.memory_space<vmem>>, %arg4: memref<2x1xf32, #tpu.memory_space<vmem>>, %arg5: memref<2x8x256xf32, #tpu.memory_space<vmem>>, %arg6: memref<1x8x1xf32, #tpu.memory_space<vmem>>, %arg7: memref<1x8x1xf32, #tpu.memory_space<vmem>>) attributes {dimension_semantics = [#tpu.dimension_semantics<parallel>], iteration_bounds = array<i64: 1>, scalar_prefetch = 0 : i64, scratch_operands = 0 : i64, tpu.core_type = #tpu.core_type<tc>, window_params = [{transform_indices = @transform_0, window_bounds = array<i64: 2, 2, 256>}, {pipeline_mode = #tpu.pipeline_mode<synchronous>, transform_indices = @transform_1, window_bounds = array<i64: 4, 8, 2>}, {pipeline_mode = #tpu.pipeline_mode<synchronous>, transform_indices = @transform_2, window_bounds = array<i64: 2, 1>}, {pipeline_mode = #tpu.pipeline_mode<synchronous>, transform_indices = @transform_3, window_bounds = array<i64: 2, 1>}, {transform_indices = @transform_4, window_bounds = array<i64: 2, 8, 256>}, {transform_indices = @transform_5, window_bounds = array<i64: 1, 8, 1>}, {transform_indices = @transform_6, window_bounds = array<i64: 1, 8, 1>}]} {
    %c0 = arith.constant 0 : index
    %c0_0 = arith.constant 0 : index
    %c0_1 = arith.constant 0 : index
    %0 = vector.load %arg2[%c0, %c0_0, %c0_1] : memref<4x8x2xf32, #tpu.memory_space<vmem>>, vector<4x8x2xf32>
    %c0_2 = arith.constant 0 : index
    %c0_3 = arith.constant 0 : index
    %1 = vector.load %arg3[%c0_2, %c0_3] : memref<2x1xf32, #tpu.memory_space<vmem>>, vector<2x1xf32>
    %c0_4 = arith.constant 0 : index
    %c0_5 = arith.constant 0 : index
    %2 = vector.load %arg4[%c0_4, %c0_5] : memref<2x1xf32, #tpu.memory_space<vmem>>, vector<2x1xf32>
    %3 = tpu.iota {dimensions = array<i32: 1>} : vector<1x256xi32>
    %c16_i32 = arith.constant 16 : i32
    %c0_i32 = arith.constant 0 : i32
    %4 = arith.cmpi eq, %c16_i32, %c0_i32 : i32
    %c1_i32 = arith.constant 1 : i32
    %5 = arith.select %4, %c1_i32, %c16_i32 : i32
    %6 = vector.broadcast %5 : i32 to vector<1x256xi32>
    %7 = arith.remsi %3, %6 : vector<1x256xi32>
    %c0_i32_6 = arith.constant 0 : i32
    %8 = vector.broadcast %c0_i32_6 : i32 to vector<1x256xi32>
    %9 = arith.cmpi ne, %7, %8 : vector<1x256xi32>
    %c0_i32_7 = arith.constant 0 : i32
    %10 = vector.broadcast %c0_i32_7 : i32 to vector<1x256xi32>
    %11 = arith.cmpi slt, %7, %10 : vector<1x256xi32>
    %c0_i32_8 = arith.constant 0 : i32
    %12 = arith.cmpi slt, %5, %c0_i32_8 : i32
    %13 = vector.broadcast %12 : i1 to vector<1x256xi1>
    %14 = vector.broadcast %13 : vector<1x256xi1> to vector<1x256xi1>
    %15 = arith.xori %11, %14 : vector<1x256xi1>
    %16 = arith.andi %15, %9 : vector<1x256xi1>
    %17 = vector.broadcast %5 : i32 to vector<1x256xi32>
    %18 = arith.addi %7, %17 : vector<1x256xi32>
    %19 = arith.select %16, %18, %7 : vector<1x256xi1>, vector<1x256xi32>
    %c15_i32 = arith.constant 15 : i32
    %20 = vector.broadcast %c15_i32 : i32 to vector<1x256xi32>
    %21 = arith.cmpi ne, %19, %20 : vector<1x256xi32>
    %c240_i32 = arith.constant 240 : i32
    %22 = vector.broadcast %c240_i32 : i32 to vector<1x256xi32>
    %23 = arith.cmpi slt, %3, %22 : vector<1x256xi32>
    %24 = arith.andi %21, %23 : vector<1x256xi1>
    %cst = arith.constant 0.000000e+00 : f32
    %25 = vector.broadcast %cst : f32 to vector<8x1xf32>
    %cst_9 = arith.constant 0.000000e+00 : f32
    %26 = vector.broadcast %cst_9 : f32 to vector<8x1xf32>
    %c0_10 = arith.constant 0 : index
    %c0_11 = arith.constant 0 : index
    %c0_12 = arith.constant 0 : index
    %27 = vector.load %arg1[%c0_10, %c0_11, %c0_12] : memref<2x2x256xf32, #tpu.memory_space<vmem>>, vector<1x2x256xf32>
    %28 = vector.shape_cast %27 : vector<1x2x256xf32> to vector<2x256xf32>
    %29 = vector.broadcast %1 : vector<2x1xf32> to vector<2x256xf32>
    %30 = arith.mulf %28, %29 : vector<2x256xf32>
    %31 = vector.broadcast %2 : vector<2x1xf32> to vector<2x256xf32>
    %32 = arith.addf %30, %31 : vector<2x256xf32>
    %cst_13 = arith.constant 0.000000e+00 : f32
    %33 = vector.broadcast %cst_13 : f32 to vector<2x256xf32>
    %34 = arith.maximumf %32, %33 : vector<2x256xf32>
    %c255_i32 = arith.constant 255 : i32
    %35 = tpu.dynamic_rotate %34 by %c255_i32 dim 1 : vector<2x256xf32>, i32 -> vector<2x256xf32>
    %cst_14 = arith.constant 0.000000e+00 : f32
    %36 = vector.shape_cast %21 : vector<1x256xi1> to vector<1x256xi1>
    %37 = vector.broadcast %36 : vector<1x256xi1> to vector<2x256xi1>
    %38 = vector.broadcast %cst_14 : f32 to vector<2x256xf32>
    %39 = arith.select %37, %35, %38 : vector<2x256xi1>, vector<2x256xf32>
    %c240_i32_15 = arith.constant 240 : i32
    %40 = tpu.dynamic_rotate %34 by %c240_i32_15 dim 1 : vector<2x256xf32>, i32 -> vector<2x256xf32>
    %cst_16 = arith.constant 0.000000e+00 : f32
    %41 = vector.shape_cast %23 : vector<1x256xi1> to vector<1x256xi1>
    %42 = vector.broadcast %41 : vector<1x256xi1> to vector<2x256xi1>
    %43 = vector.broadcast %cst_16 : f32 to vector<2x256xf32>
    %44 = arith.select %42, %40, %43 : vector<2x256xi1>, vector<2x256xf32>
    %c239_i32 = arith.constant 239 : i32
    %45 = tpu.dynamic_rotate %34 by %c239_i32 dim 1 : vector<2x256xf32>, i32 -> vector<2x256xf32>
    %cst_17 = arith.constant 0.000000e+00 : f32
    %46 = vector.shape_cast %24 : vector<1x256xi1> to vector<1x256xi1>
    %47 = vector.broadcast %46 : vector<1x256xi1> to vector<2x256xi1>
    %48 = vector.broadcast %cst_17 : f32 to vector<2x256xf32>
    %49 = arith.select %47, %45, %48 : vector<2x256xi1>, vector<2x256xf32>
    %50 = vector.extract_strided_slice %0 {offsets = [0, 0, 0], sizes = [1, 8, 2], strides = [1, 1, 1]} : vector<4x8x2xf32> to vector<1x8x2xf32>
    %51 = vector.shape_cast %50 : vector<1x8x2xf32> to vector<8x2xf32>
    %cst_18 = arith.constant dense<0.000000e+00> : vector<8x256xf32>
    %52 = tpu.matmul %51, %34, %cst_18 {dimension_numbers = #tpu.dot_dimension_numbers<[1], [0], [0], [1], [0, 0, 1, 1], [], []>} : vector<8x2xf32>, vector<2x256xf32>, vector<8x256xf32> -> vector<8x256xf32>
    %53 = vector.extract_strided_slice %0 {offsets = [1, 0, 0], sizes = [1, 8, 2], strides = [1, 1, 1]} : vector<4x8x2xf32> to vector<1x8x2xf32>
    %54 = vector.shape_cast %53 : vector<1x8x2xf32> to vector<8x2xf32>
    %cst_19 = arith.constant dense<0.000000e+00> : vector<8x256xf32>
    %55 = tpu.matmul %54, %39, %cst_19 {dimension_numbers = #tpu.dot_dimension_numbers<[1], [0], [0], [1], [0, 0, 1, 1], [], []>} : vector<8x2xf32>, vector<2x256xf32>, vector<8x256xf32> -> vector<8x256xf32>
    %56 = arith.addf %52, %55 : vector<8x256xf32>
    %57 = vector.extract_strided_slice %0 {offsets = [2, 0, 0], sizes = [1, 8, 2], strides = [1, 1, 1]} : vector<4x8x2xf32> to vector<1x8x2xf32>
    %58 = vector.shape_cast %57 : vector<1x8x2xf32> to vector<8x2xf32>
    %cst_20 = arith.constant dense<0.000000e+00> : vector<8x256xf32>
    %59 = tpu.matmul %58, %44, %cst_20 {dimension_numbers = #tpu.dot_dimension_numbers<[1], [0], [0], [1], [0, 0, 1, 1], [], []>} : vector<8x2xf32>, vector<2x256xf32>, vector<8x256xf32> -> vector<8x256xf32>
    %60 = arith.addf %56, %59 : vector<8x256xf32>
    %61 = vector.extract_strided_slice %0 {offsets = [3, 0, 0], sizes = [1, 8, 2], strides = [1, 1, 1]} : vector<4x8x2xf32> to vector<1x8x2xf32>
    %62 = vector.shape_cast %61 : vector<1x8x2xf32> to vector<8x2xf32>
    %cst_21 = arith.constant dense<0.000000e+00> : vector<8x256xf32>
    %63 = tpu.matmul %62, %49, %cst_21 {dimension_numbers = #tpu.dot_dimension_numbers<[1], [0], [0], [1], [0, 0, 1, 1], [], []>} : vector<8x2xf32>, vector<2x256xf32>, vector<8x256xf32> -> vector<8x256xf32>
    %64 = arith.addf %60, %63 : vector<8x256xf32>
    %c0_22 = arith.constant 0 : index
    %c0_23 = arith.constant 0 : index
    %c0_24 = arith.constant 0 : index
    %65 = vector.load %arg5[%c0_22, %c0_23, %c0_24] : memref<2x8x256xf32, #tpu.memory_space<vmem>>, vector<1x8x256xf32>
    %66 = vector.shape_cast %65 : vector<1x8x256xf32> to vector<8x256xf32>
    %67 = vector.shape_cast %64 : vector<8x256xf32> to vector<1x8x256xf32>
    tpu.vector_store %arg5[%c0_22, %c0_23, %c0_24], %67 {strides = array<i32>} : memref<2x8x256xf32, #tpu.memory_space<vmem>>, vector<1x8x256xf32>,
    %cst_25 = arith.constant dense<0.000000e+00> : vector<8xf32>
    %68 = vector.multi_reduction <add>, %64, %cst_25 [1] : vector<8x256xf32> to vector<8xf32>
    %69 = vector.shape_cast %68 : vector<8xf32> to vector<8x1xf32>
    %70 = arith.addf %25, %69 : vector<8x1xf32>
    %71 = arith.mulf %64, %64 : vector<8x256xf32>
    %cst_26 = arith.constant dense<0.000000e+00> : vector<8xf32>
    %72 = vector.multi_reduction <add>, %71, %cst_26 [1] : vector<8x256xf32> to vector<8xf32>
    %73 = vector.shape_cast %72 : vector<8xf32> to vector<8x1xf32>
    %74 = arith.addf %26, %73 : vector<8x1xf32>
    %c1 = arith.constant 1 : index
    %c0_27 = arith.constant 0 : index
    %c0_28 = arith.constant 0 : index
    %75 = vector.load %arg1[%c1, %c0_27, %c0_28] : memref<2x2x256xf32, #tpu.memory_space<vmem>>, vector<1x2x256xf32>
    %76 = vector.shape_cast %75 : vector<1x2x256xf32> to vector<2x256xf32>
    %77 = vector.broadcast %1 : vector<2x1xf32> to vector<2x256xf32>
    %78 = arith.mulf %76, %77 : vector<2x256xf32>
    %79 = vector.broadcast %2 : vector<2x1xf32> to vector<2x256xf32>
    %80 = arith.addf %78, %79 : vector<2x256xf32>
    %cst_29 = arith.constant 0.000000e+00 : f32
    %81 = vector.broadcast %cst_29 : f32 to vector<2x256xf32>
    %82 = arith.maximumf %80, %81 : vector<2x256xf32>
    %c255_i32_30 = arith.constant 255 : i32
    %83 = tpu.dynamic_rotate %82 by %c255_i32_30 dim 1 : vector<2x256xf32>, i32 -> vector<2x256xf32>
    %cst_31 = arith.constant 0.000000e+00 : f32
    %84 = vector.shape_cast %21 : vector<1x256xi1> to vector<1x256xi1>
    %85 = vector.broadcast %84 : vector<1x256xi1> to vector<2x256xi1>
    %86 = vector.broadcast %cst_31 : f32 to vector<2x256xf32>
    %87 = arith.select %85, %83, %86 : vector<2x256xi1>, vector<2x256xf32>
    %c240_i32_32 = arith.constant 240 : i32
    %88 = tpu.dynamic_rotate %82 by %c240_i32_32 dim 1 : vector<2x256xf32>, i32 -> vector<2x256xf32>
    %cst_33 = arith.constant 0.000000e+00 : f32
    %89 = vector.shape_cast %23 : vector<1x256xi1> to vector<1x256xi1>
    %90 = vector.broadcast %89 : vector<1x256xi1> to vector<2x256xi1>
    %91 = vector.broadcast %cst_33 : f32 to vector<2x256xf32>
    %92 = arith.select %90, %88, %91 : vector<2x256xi1>, vector<2x256xf32>
    %c239_i32_34 = arith.constant 239 : i32
    %93 = tpu.dynamic_rotate %82 by %c239_i32_34 dim 1 : vector<2x256xf32>, i32 -> vector<2x256xf32>
    %cst_35 = arith.constant 0.000000e+00 : f32
    %94 = vector.shape_cast %24 : vector<1x256xi1> to vector<1x256xi1>
    %95 = vector.broadcast %94 : vector<1x256xi1> to vector<2x256xi1>
    %96 = vector.broadcast %cst_35 : f32 to vector<2x256xf32>
    %97 = arith.select %95, %93, %96 : vector<2x256xi1>, vector<2x256xf32>
    %98 = vector.extract_strided_slice %0 {offsets = [0, 0, 0], sizes = [1, 8, 2], strides = [1, 1, 1]} : vector<4x8x2xf32> to vector<1x8x2xf32>
    %99 = vector.shape_cast %98 : vector<1x8x2xf32> to vector<8x2xf32>
    %cst_36 = arith.constant dense<0.000000e+00> : vector<8x256xf32>
    %100 = tpu.matmul %99, %82, %cst_36 {dimension_numbers = #tpu.dot_dimension_numbers<[1], [0], [0], [1], [0, 0, 1, 1], [], []>} : vector<8x2xf32>, vector<2x256xf32>, vector<8x256xf32> -> vector<8x256xf32>
    %101 = vector.extract_strided_slice %0 {offsets = [1, 0, 0], sizes = [1, 8, 2], strides = [1, 1, 1]} : vector<4x8x2xf32> to vector<1x8x2xf32>
    %102 = vector.shape_cast %101 : vector<1x8x2xf32> to vector<8x2xf32>
    %cst_37 = arith.constant dense<0.000000e+00> : vector<8x256xf32>
    %103 = tpu.matmul %102, %87, %cst_37 {dimension_numbers = #tpu.dot_dimension_numbers<[1], [0], [0], [1], [0, 0, 1, 1], [], []>} : vector<8x2xf32>, vector<2x256xf32>, vector<8x256xf32> -> vector<8x256xf32>
    %104 = arith.addf %100, %103 : vector<8x256xf32>
    %105 = vector.extract_strided_slice %0 {offsets = [2, 0, 0], sizes = [1, 8, 2], strides = [1, 1, 1]} : vector<4x8x2xf32> to vector<1x8x2xf32>
    %106 = vector.shape_cast %105 : vector<1x8x2xf32> to vector<8x2xf32>
    %cst_38 = arith.constant dense<0.000000e+00> : vector<8x256xf32>
    %107 = tpu.matmul %106, %92, %cst_38 {dimension_numbers = #tpu.dot_dimension_numbers<[1], [0], [0], [1], [0, 0, 1, 1], [], []>} : vector<8x2xf32>, vector<2x256xf32>, vector<8x256xf32> -> vector<8x256xf32>
    %108 = arith.addf %104, %107 : vector<8x256xf32>
    %109 = vector.extract_strided_slice %0 {offsets = [3, 0, 0], sizes = [1, 8, 2], strides = [1, 1, 1]} : vector<4x8x2xf32> to vector<1x8x2xf32>
    %110 = vector.shape_cast %109 : vector<1x8x2xf32> to vector<8x2xf32>
    %cst_39 = arith.constant dense<0.000000e+00> : vector<8x256xf32>
    %111 = tpu.matmul %110, %97, %cst_39 {dimension_numbers = #tpu.dot_dimension_numbers<[1], [0], [0], [1], [0, 0, 1, 1], [], []>} : vector<8x2xf32>, vector<2x256xf32>, vector<8x256xf32> -> vector<8x256xf32>
    %112 = arith.addf %108, %111 : vector<8x256xf32>
    %c1_40 = arith.constant 1 : index
    %c0_41 = arith.constant 0 : index
    %c0_42 = arith.constant 0 : index
    %113 = vector.load %arg5[%c1_40, %c0_41, %c0_42] : memref<2x8x256xf32, #tpu.memory_space<vmem>>, vector<1x8x256xf32>
    %114 = vector.shape_cast %113 : vector<1x8x256xf32> to vector<8x256xf32>
    %115 = vector.shape_cast %112 : vector<8x256xf32> to vector<1x8x256xf32>
    tpu.vector_store %arg5[%c1_40, %c0_41, %c0_42], %115 {strides = array<i32>} : memref<2x8x256xf32, #tpu.memory_space<vmem>>, vector<1x8x256xf32>,
    %cst_43 = arith.constant dense<0.000000e+00> : vector<8xf32>
    %116 = vector.multi_reduction <add>, %112, %cst_43 [1] : vector<8x256xf32> to vector<8xf32>
    %117 = vector.shape_cast %116 : vector<8xf32> to vector<8x1xf32>
    %118 = arith.addf %70, %117 : vector<8x1xf32>
    %119 = arith.mulf %112, %112 : vector<8x256xf32>
    %cst_44 = arith.constant dense<0.000000e+00> : vector<8xf32>
    %120 = vector.multi_reduction <add>, %119, %cst_44 [1] : vector<8x256xf32> to vector<8xf32>
    %121 = vector.shape_cast %120 : vector<8xf32> to vector<8x1xf32>
    %122 = arith.addf %74, %121 : vector<8x1xf32>
    %123 = vector.shape_cast %118 : vector<8x1xf32> to vector<1x8x1xf32>
    %c0_45 = arith.constant 0 : index
    %c0_46 = arith.constant 0 : index
    %c0_47 = arith.constant 0 : index
    %124 = vector.load %arg6[%c0_45, %c0_46, %c0_47] : memref<1x8x1xf32, #tpu.memory_space<vmem>>, vector<1x8x1xf32>
    tpu.vector_store %arg6[%c0_45, %c0_46, %c0_47], %123 {strides = array<i32>} : memref<1x8x1xf32, #tpu.memory_space<vmem>>, vector<1x8x1xf32>,
    %125 = vector.shape_cast %122 : vector<8x1xf32> to vector<1x8x1xf32>
    %c0_48 = arith.constant 0 : index
    %c0_49 = arith.constant 0 : index
    %c0_50 = arith.constant 0 : index
    %126 = vector.load %arg7[%c0_48, %c0_49, %c0_50] : memref<1x8x1xf32, #tpu.memory_space<vmem>>, vector<1x8x1xf32>
    tpu.vector_store %arg7[%c0_48, %c0_49, %c0_50], %125 {strides = array<i32>} : memref<1x8x1xf32, #tpu.memory_space<vmem>>, vector<1x8x1xf32>,
    return
  }
  func.func @transform_0(%arg0: i32) -> (i32, i32, i32) {
    %c0_i32 = arith.constant 0 : i32
    %c0_i32_0 = arith.constant 0 : i32
    %c0_i32_1 = arith.constant 0 : i32
    return %arg0, %c0_i32, %c0_i32_0 : i32, i32, i32
  }
  func.func @transform_1(%arg0: i32) -> (i32, i32, i32) {
    %c0_i32 = arith.constant 0 : i32
    %c0_i32_0 = arith.constant 0 : i32
    %c0_i32_1 = arith.constant 0 : i32
    %c0_i32_2 = arith.constant 0 : i32
    return %c0_i32, %c0_i32_0, %c0_i32_1 : i32, i32, i32
  }
  func.func @transform_2(%arg0: i32) -> (i32, i32) {
    %c0_i32 = arith.constant 0 : i32
    %c0_i32_0 = arith.constant 0 : i32
    %c0_i32_1 = arith.constant 0 : i32
    return %c0_i32, %c0_i32_0 : i32, i32
  }
  func.func @transform_3(%arg0: i32) -> (i32, i32) {
    %c0_i32 = arith.constant 0 : i32
    %c0_i32_0 = arith.constant 0 : i32
    %c0_i32_1 = arith.constant 0 : i32
    return %c0_i32, %c0_i32_0 : i32, i32
  }
  func.func @transform_4(%arg0: i32) -> (i32, i32, i32) {
    %c0_i32 = arith.constant 0 : i32
    %c0_i32_0 = arith.constant 0 : i32
    %c0_i32_1 = arith.constant 0 : i32
    return %arg0, %c0_i32, %c0_i32_0 : i32, i32, i32
  }
  func.func @transform_5(%arg0: i32) -> (i32, i32, i32) {
    %c0_i32 = arith.constant 0 : i32
    %c0_i32_0 = arith.constant 0 : i32
    %c0_i32_1 = arith.constant 0 : i32
    return %arg0, %c0_i32, %c0_i32_0 : i32, i32, i32
  }
  func.func @transform_6(%arg0: i32) -> (i32, i32, i32) {
    %c0_i32 = arith.constant 0 : i32
    %c0_i32_0 = arith.constant 0 : i32
    %c0_i32_1 = arith.constant 0 : i32
    return %arg0, %c0_i32, %c0_i32_0 : i32, i32, i32
  }
}

module attributes {stable_mosaic.version = 11 : i64} {
  func.func @conv3_kernel(%arg0: i32, %arg1: memref<2x8x256xf32, #tpu.memory_space<vmem>>, %arg2: memref<16x8xf32, #tpu.memory_space<vmem>>, %arg3: memref<8x1xf32, #tpu.memory_space<vmem>>, %arg4: memref<8x1xf32, #tpu.memory_space<vmem>>, %arg5: memref<2x16x256xf32, #tpu.memory_space<vmem>>, %arg6: memref<1x16x1xf32, #tpu.memory_space<vmem>>, %arg7: memref<1x16x1xf32, #tpu.memory_space<vmem>>) attributes {dimension_semantics = [#tpu.dimension_semantics<parallel>], iteration_bounds = array<i64: 1>, scalar_prefetch = 0 : i64, scratch_operands = 0 : i64, tpu.core_type = #tpu.core_type<tc>, window_params = [{transform_indices = @transform_0, window_bounds = array<i64: 2, 8, 256>}, {pipeline_mode = #tpu.pipeline_mode<synchronous>, transform_indices = @transform_1, window_bounds = array<i64: 16, 8>}, {pipeline_mode = #tpu.pipeline_mode<synchronous>, transform_indices = @transform_2, window_bounds = array<i64: 8, 1>}, {pipeline_mode = #tpu.pipeline_mode<synchronous>, transform_indices = @transform_3, window_bounds = array<i64: 8, 1>}, {transform_indices = @transform_4, window_bounds = array<i64: 2, 16, 256>}, {transform_indices = @transform_5, window_bounds = array<i64: 1, 16, 1>}, {transform_indices = @transform_6, window_bounds = array<i64: 1, 16, 1>}]} {
    %c0 = arith.constant 0 : index
    %c0_0 = arith.constant 0 : index
    %0 = vector.load %arg2[%c0, %c0_0] : memref<16x8xf32, #tpu.memory_space<vmem>>, vector<16x8xf32>
    %c0_1 = arith.constant 0 : index
    %c0_2 = arith.constant 0 : index
    %1 = vector.load %arg3[%c0_1, %c0_2] : memref<8x1xf32, #tpu.memory_space<vmem>>, vector<8x1xf32>
    %c0_3 = arith.constant 0 : index
    %c0_4 = arith.constant 0 : index
    %2 = vector.load %arg4[%c0_3, %c0_4] : memref<8x1xf32, #tpu.memory_space<vmem>>, vector<8x1xf32>
    %cst = arith.constant 0.000000e+00 : f32
    %3 = vector.broadcast %cst : f32 to vector<16x1xf32>
    %cst_5 = arith.constant 0.000000e+00 : f32
    %4 = vector.broadcast %cst_5 : f32 to vector<16x1xf32>
    %c0_6 = arith.constant 0 : index
    %c0_7 = arith.constant 0 : index
    %c0_8 = arith.constant 0 : index
    %5 = vector.load %arg1[%c0_6, %c0_7, %c0_8] : memref<2x8x256xf32, #tpu.memory_space<vmem>>, vector<1x8x256xf32>
    %6 = vector.shape_cast %5 : vector<1x8x256xf32> to vector<8x256xf32>
    %7 = vector.broadcast %1 : vector<8x1xf32> to vector<8x256xf32>
    %8 = arith.mulf %6, %7 : vector<8x256xf32>
    %9 = vector.broadcast %2 : vector<8x1xf32> to vector<8x256xf32>
    %10 = arith.addf %8, %9 : vector<8x256xf32>
    %cst_9 = arith.constant 0.000000e+00 : f32
    %11 = vector.broadcast %cst_9 : f32 to vector<8x256xf32>
    %12 = arith.maximumf %10, %11 : vector<8x256xf32>
    %cst_10 = arith.constant dense<0.000000e+00> : vector<16x256xf32>
    %13 = tpu.matmul %0, %12, %cst_10 {dimension_numbers = #tpu.dot_dimension_numbers<[1], [0], [0], [1], [0, 0, 1, 1], [], []>} : vector<16x8xf32>, vector<8x256xf32>, vector<16x256xf32> -> vector<16x256xf32>
    %c0_11 = arith.constant 0 : index
    %c0_12 = arith.constant 0 : index
    %c0_13 = arith.constant 0 : index
    %14 = vector.load %arg5[%c0_11, %c0_12, %c0_13] : memref<2x16x256xf32, #tpu.memory_space<vmem>>, vector<1x16x256xf32>
    %15 = vector.shape_cast %14 : vector<1x16x256xf32> to vector<16x256xf32>
    %16 = vector.shape_cast %13 : vector<16x256xf32> to vector<1x16x256xf32>
    tpu.vector_store %arg5[%c0_11, %c0_12, %c0_13], %16 {strides = array<i32>} : memref<2x16x256xf32, #tpu.memory_space<vmem>>, vector<1x16x256xf32>,
    %cst_14 = arith.constant dense<0.000000e+00> : vector<16xf32>
    %17 = vector.multi_reduction <add>, %13, %cst_14 [1] : vector<16x256xf32> to vector<16xf32>
    %18 = vector.shape_cast %17 : vector<16xf32> to vector<16x1xf32>
    %19 = arith.addf %3, %18 : vector<16x1xf32>
    %20 = arith.mulf %13, %13 : vector<16x256xf32>
    %cst_15 = arith.constant dense<0.000000e+00> : vector<16xf32>
    %21 = vector.multi_reduction <add>, %20, %cst_15 [1] : vector<16x256xf32> to vector<16xf32>
    %22 = vector.shape_cast %21 : vector<16xf32> to vector<16x1xf32>
    %23 = arith.addf %4, %22 : vector<16x1xf32>
    %c1 = arith.constant 1 : index
    %c0_16 = arith.constant 0 : index
    %c0_17 = arith.constant 0 : index
    %24 = vector.load %arg1[%c1, %c0_16, %c0_17] : memref<2x8x256xf32, #tpu.memory_space<vmem>>, vector<1x8x256xf32>
    %25 = vector.shape_cast %24 : vector<1x8x256xf32> to vector<8x256xf32>
    %26 = vector.broadcast %1 : vector<8x1xf32> to vector<8x256xf32>
    %27 = arith.mulf %25, %26 : vector<8x256xf32>
    %28 = vector.broadcast %2 : vector<8x1xf32> to vector<8x256xf32>
    %29 = arith.addf %27, %28 : vector<8x256xf32>
    %cst_18 = arith.constant 0.000000e+00 : f32
    %30 = vector.broadcast %cst_18 : f32 to vector<8x256xf32>
    %31 = arith.maximumf %29, %30 : vector<8x256xf32>
    %cst_19 = arith.constant dense<0.000000e+00> : vector<16x256xf32>
    %32 = tpu.matmul %0, %31, %cst_19 {dimension_numbers = #tpu.dot_dimension_numbers<[1], [0], [0], [1], [0, 0, 1, 1], [], []>} : vector<16x8xf32>, vector<8x256xf32>, vector<16x256xf32> -> vector<16x256xf32>
    %c1_20 = arith.constant 1 : index
    %c0_21 = arith.constant 0 : index
    %c0_22 = arith.constant 0 : index
    %33 = vector.load %arg5[%c1_20, %c0_21, %c0_22] : memref<2x16x256xf32, #tpu.memory_space<vmem>>, vector<1x16x256xf32>
    %34 = vector.shape_cast %33 : vector<1x16x256xf32> to vector<16x256xf32>
    %35 = vector.shape_cast %32 : vector<16x256xf32> to vector<1x16x256xf32>
    tpu.vector_store %arg5[%c1_20, %c0_21, %c0_22], %35 {strides = array<i32>} : memref<2x16x256xf32, #tpu.memory_space<vmem>>, vector<1x16x256xf32>,
    %cst_23 = arith.constant dense<0.000000e+00> : vector<16xf32>
    %36 = vector.multi_reduction <add>, %32, %cst_23 [1] : vector<16x256xf32> to vector<16xf32>
    %37 = vector.shape_cast %36 : vector<16xf32> to vector<16x1xf32>
    %38 = arith.addf %19, %37 : vector<16x1xf32>
    %39 = arith.mulf %32, %32 : vector<16x256xf32>
    %cst_24 = arith.constant dense<0.000000e+00> : vector<16xf32>
    %40 = vector.multi_reduction <add>, %39, %cst_24 [1] : vector<16x256xf32> to vector<16xf32>
    %41 = vector.shape_cast %40 : vector<16xf32> to vector<16x1xf32>
    %42 = arith.addf %23, %41 : vector<16x1xf32>
    %43 = vector.shape_cast %38 : vector<16x1xf32> to vector<1x16x1xf32>
    %c0_25 = arith.constant 0 : index
    %c0_26 = arith.constant 0 : index
    %c0_27 = arith.constant 0 : index
    %44 = vector.load %arg6[%c0_25, %c0_26, %c0_27] : memref<1x16x1xf32, #tpu.memory_space<vmem>>, vector<1x16x1xf32>
    tpu.vector_store %arg6[%c0_25, %c0_26, %c0_27], %43 {strides = array<i32>} : memref<1x16x1xf32, #tpu.memory_space<vmem>>, vector<1x16x1xf32>,
    %45 = vector.shape_cast %42 : vector<16x1xf32> to vector<1x16x1xf32>
    %c0_28 = arith.constant 0 : index
    %c0_29 = arith.constant 0 : index
    %c0_30 = arith.constant 0 : index
    %46 = vector.load %arg7[%c0_28, %c0_29, %c0_30] : memref<1x16x1xf32, #tpu.memory_space<vmem>>, vector<1x16x1xf32>
    tpu.vector_store %arg7[%c0_28, %c0_29, %c0_30], %45 {strides = array<i32>} : memref<1x16x1xf32, #tpu.memory_space<vmem>>, vector<1x16x1xf32>,
    return
  }
  func.func @transform_0(%arg0: i32) -> (i32, i32, i32) {
    %c0_i32 = arith.constant 0 : i32
    %c0_i32_0 = arith.constant 0 : i32
    %c0_i32_1 = arith.constant 0 : i32
    return %arg0, %c0_i32, %c0_i32_0 : i32, i32, i32
  }
  func.func @transform_1(%arg0: i32) -> (i32, i32) {
    %c0_i32 = arith.constant 0 : i32
    %c0_i32_0 = arith.constant 0 : i32
    %c0_i32_1 = arith.constant 0 : i32
    return %c0_i32, %c0_i32_0 : i32, i32
  }
  func.func @transform_2(%arg0: i32) -> (i32, i32) {
    %c0_i32 = arith.constant 0 : i32
    %c0_i32_0 = arith.constant 0 : i32
    %c0_i32_1 = arith.constant 0 : i32
    return %c0_i32, %c0_i32_0 : i32, i32
  }
  func.func @transform_3(%arg0: i32) -> (i32, i32) {
    %c0_i32 = arith.constant 0 : i32
    %c0_i32_0 = arith.constant 0 : i32
    %c0_i32_1 = arith.constant 0 : i32
    return %c0_i32, %c0_i32_0 : i32, i32
  }
  func.func @transform_4(%arg0: i32) -> (i32, i32, i32) {
    %c0_i32 = arith.constant 0 : i32
    %c0_i32_0 = arith.constant 0 : i32
    %c0_i32_1 = arith.constant 0 : i32
    return %arg0, %c0_i32, %c0_i32_0 : i32, i32, i32
  }
  func.func @transform_5(%arg0: i32) -> (i32, i32, i32) {
    %c0_i32 = arith.constant 0 : i32
    %c0_i32_0 = arith.constant 0 : i32
    %c0_i32_1 = arith.constant 0 : i32
    return %arg0, %c0_i32, %c0_i32_0 : i32, i32, i32
  }
  func.func @transform_6(%arg0: i32) -> (i32, i32, i32) {
    %c0_i32 = arith.constant 0 : i32
    %c0_i32_0 = arith.constant 0 : i32
    %c0_i32_1 = arith.constant 0 : i32
    return %arg0, %c0_i32, %c0_i32_0 : i32, i32, i32
  }
}

module attributes {stable_mosaic.version = 11 : i64} {
  func.func @bn3_kernel(%arg0: i32, %arg1: memref<2x16x256xf32, #tpu.memory_space<vmem>>, %arg2: memref<16x1xf32, #tpu.memory_space<vmem>>, %arg3: memref<16x1xf32, #tpu.memory_space<vmem>>, %arg4: memref<2x16x256xf32, #tpu.memory_space<vmem>>) attributes {dimension_semantics = [#tpu.dimension_semantics<parallel>], iteration_bounds = array<i64: 1>, scalar_prefetch = 0 : i64, scratch_operands = 0 : i64, tpu.core_type = #tpu.core_type<tc>, window_params = [{transform_indices = @transform_0, window_bounds = array<i64: 2, 16, 256>}, {pipeline_mode = #tpu.pipeline_mode<synchronous>, transform_indices = @transform_1, window_bounds = array<i64: 16, 1>}, {pipeline_mode = #tpu.pipeline_mode<synchronous>, transform_indices = @transform_2, window_bounds = array<i64: 16, 1>}, {transform_indices = @transform_3, window_bounds = array<i64: 2, 16, 256>}]} {
    %c0 = arith.constant 0 : index
    %c0_0 = arith.constant 0 : index
    %c0_1 = arith.constant 0 : index
    %0 = vector.load %arg1[%c0, %c0_0, %c0_1] : memref<2x16x256xf32, #tpu.memory_space<vmem>>, vector<2x16x256xf32>
    %c0_2 = arith.constant 0 : index
    %c0_3 = arith.constant 0 : index
    %1 = vector.load %arg2[%c0_2, %c0_3] : memref<16x1xf32, #tpu.memory_space<vmem>>, vector<16x1xf32>
    %2 = vector.shape_cast %1 : vector<16x1xf32> to vector<1x16x1xf32>
    %3 = vector.broadcast %2 : vector<1x16x1xf32> to vector<2x16x256xf32>
    %4 = arith.mulf %0, %3 : vector<2x16x256xf32>
    %c0_4 = arith.constant 0 : index
    %c0_5 = arith.constant 0 : index
    %5 = vector.load %arg3[%c0_4, %c0_5] : memref<16x1xf32, #tpu.memory_space<vmem>>, vector<16x1xf32>
    %6 = vector.shape_cast %5 : vector<16x1xf32> to vector<1x16x1xf32>
    %7 = vector.broadcast %6 : vector<1x16x1xf32> to vector<2x16x256xf32>
    %8 = arith.addf %4, %7 : vector<2x16x256xf32>
    %cst = arith.constant 0.000000e+00 : f32
    %9 = vector.broadcast %cst : f32 to vector<2x16x256xf32>
    %10 = arith.maximumf %8, %9 : vector<2x16x256xf32>
    %c0_6 = arith.constant 0 : index
    %c0_7 = arith.constant 0 : index
    %c0_8 = arith.constant 0 : index
    %11 = vector.load %arg4[%c0_6, %c0_7, %c0_8] : memref<2x16x256xf32, #tpu.memory_space<vmem>>, vector<2x16x256xf32>
    tpu.vector_store %arg4[%c0_6, %c0_7, %c0_8], %10 {strides = array<i32>} : memref<2x16x256xf32, #tpu.memory_space<vmem>>, vector<2x16x256xf32>,
    return
  }
  func.func @transform_0(%arg0: i32) -> (i32, i32, i32) {
    %c0_i32 = arith.constant 0 : i32
    %c0_i32_0 = arith.constant 0 : i32
    %c0_i32_1 = arith.constant 0 : i32
    return %arg0, %c0_i32, %c0_i32_0 : i32, i32, i32
  }
  func.func @transform_1(%arg0: i32) -> (i32, i32) {
    %c0_i32 = arith.constant 0 : i32
    %c0_i32_0 = arith.constant 0 : i32
    %c0_i32_1 = arith.constant 0 : i32
    return %c0_i32, %c0_i32_0 : i32, i32
  }
  func.func @transform_2(%arg0: i32) -> (i32, i32) {
    %c0_i32 = arith.constant 0 : i32
    %c0_i32_0 = arith.constant 0 : i32
    %c0_i32_1 = arith.constant 0 : i32
    return %c0_i32, %c0_i32_0 : i32, i32
  }
  func.func @transform_3(%arg0: i32) -> (i32, i32, i32) {
    %c0_i32 = arith.constant 0 : i32
    %c0_i32_0 = arith.constant 0 : i32
    %c0_i32_1 = arith.constant 0 : i32
    return %arg0, %c0_i32, %c0_i32_0 : i32, i32, i32
  }
}

</mosaic_0001>

<bundles_post_ra>
// kernel: squeeze.26
= control target key start
LH: loop header
LB: loop body
LE: loop exit
PB: predicated region body
PF: predicated region fallthrough
CT: control target
= control target key end

     0   :  { %s40_s8 = smov 122   ;;  %vm8_vm0 = vcmask 15360   ;;  %s41_s9 = smov 124   ;;  %s58_s0 = inlined_call_operand.vmem [shape: f32[8], index: 0, kind: input, shape index: {}]   ;;  %s59_s1 = inlined_call_operand.vmem [shape: f32[4,2], index: 1, kind: output, shape index: {}]  }
   0x1   :  { %v5_v0 = vld [vmem:[%s58_s0] sm:$0x1]  ;;  %s39_s0 = smov 126  }
   0x2   :  { %6 = vst [vmem:[#allocation1] sm:$0x1] %v5_v0 }
   0x9   :  { %v10_v1 = vld [vmem:[#allocation1] sm:$0x1]  }
   0xa   :  { %v22_v2 = vld [vmem:[#allocation1] sm:$0x1]   ;;  %11 = vrot.lane.b32.xlu0 %v10_v1, %s39_s0 }
   0xb   :  { %23 = vrot.lane.b32.xlu1 %v22_v2, %s40_s8  ;;  %v7_v3 = vld [vmem:[#allocation1] sm:$0x1]  }
   0xc   :  { %v16_v4 = vld [vmem:[#allocation1] sm:$0x1]   ;;  %9 = vst.msk [vmem:[#allocation0] sm:$0x1] %vm8_vm0, %v7_v3  }
   0xe   :  { %17 = vrot.lane.b32.xlu0 %v16_v4, %s41_s9 }
  0x7c   :  { %v12_v5 = vpop.permute.xlu0 %11  }
  0x7d   :  { %v24_v6 = vpop.permute.xlu1 %23   ;;  %15 = vst.msk [vmem:[#allocation0 + $0x1] sm:$0x1] %vm8_vm0, %v12_v5  }
  0x7e   :  { %27 = vst.msk [vmem:[#allocation0 + $0x3] sm:$0x1] %vm8_vm0, %v24_v6  }
  0x80   :  { %v18_v7 = vpop.permute.xlu0 %17  }
  0x81   :  { %21 = vst.msk [vmem:[#allocation0 + $0x2] sm:$0x1] %vm8_vm0, %v18_v7  }
  0x88   :  { %v32_v8 = vld [vmem:[#allocation0] sm:$0xf] }
  0x89   :  { %35 = vst [vmem:[%s59_s1] sm:$0xf] %v32_v8 }

// kernel: tile.32
= control target key start
LH: loop header
LB: loop body
LE: loop exit
PB: predicated region body
PF: predicated region fallthrough
CT: control target
= control target key end

     0   :  { %s22_s0 = inlined_call_operand.vmem [shape: f32[2], index: 0, kind: input, shape index: {}]   ;;  %s23_s1 = inlined_call_operand.vmem [shape: f32[4,2], index: 1, kind: output, shape index: {}]  }
   0x1   :  { %v4_v0 = vld [vmem:[%s22_s0] ss:$0 sm:$0xff] }
   0x2   :  { %5 = vst [vmem:[%s23_s1] sm:$0xf] %v4_v0 }

// kernel: tile.1
= control target key start
LH: loop header
LB: loop body
LE: loop exit
PB: predicated region body
PF: predicated region fallthrough
CT: control target
= control target key end

     0   :  { %vm8_vm0 = vcmask 7168   ;;  %s38_s0 = inlined_call_operand.vmem [shape: f32[4,2], index: 0, kind: input, shape index: {}]   ;;  %s39_s1 = inlined_call_operand.vmem [shape: f32[8,1], index: 1, kind: output, shape index: {}]  }
   0x1   :  { %v5_v0 = vld [vmem:[%s38_s0] sm:$0xf]  ;;  %s18_s0 = smov 127  }
   0x2   :  { %6 = vst [vmem:[#allocation0] sm:$0xf] %v5_v0 }
   0x9   :  { %v10_v1 = vld [vmem:[#allocation0] sm:$0xf]  }
   0xa   :  { %v7_v2 = vld [vmem:[#allocation0] sm:$0xf]   ;;  %11 = vrot.lane.b32.xlu0 %v10_v1, %s18_s0 }
   0xb   :  { %9 = vst.msk [vmem:[%s39_s1] ss:$2 sm:$0xf] %vm8_vm0, %v7_v2  }
  0x7c   :  { %v12_v3 = vpop.permute.xlu0 %11  }
  0x7d   :  { %16 = vst.msk [vmem:[%s39_s1 + $0x1] ss:$2 sm:$0xf] %vm8_vm0, %v12_v3  }

// kernel: squeeze.28
= control target key start
LH: loop header
LB: loop body
LE: loop exit
PB: predicated region body
PF: predicated region fallthrough
CT: control target
= control target key end

     0   :  { %s40_s8 = smov 116   ;;  %vm8_vm0 = vcmask 31744   ;;  %s41_s9 = smov 120   ;;  %s58_s0 = inlined_call_operand.vmem [shape: f32[16], index: 0, kind: input, shape index: {}]   ;;  %s59_s1 = inlined_call_operand.vmem [shape: f32[4,4], index: 1, kind: output, shape index: {}]  }
   0x1   :  { %v5_v0 = vld [vmem:[%s58_s0] sm:$0x1]  ;;  %s39_s0 = smov 124  }
   0x2   :  { %6 = vst [vmem:[#allocation1] sm:$0x1] %v5_v0 }
   0x9   :  { %v10_v1 = vld [vmem:[#allocation1] sm:$0x1]  }
   0xa   :  { %v22_v2 = vld [vmem:[#allocation1] sm:$0x1]   ;;  %11 = vrot.lane.b32.xlu0 %v10_v1, %s39_s0 }
   0xb   :  { %23 = vrot.lane.b32.xlu1 %v22_v2, %s40_s8  ;;  %v7_v3 = vld [vmem:[#allocation1] sm:$0x1]  }
   0xc   :  { %v16_v4 = vld [vmem:[#allocation1] sm:$0x1]   ;;  %9 = vst.msk [vmem:[#allocation0] sm:$0x1] %vm8_vm0, %v7_v3  }
   0xe   :  { %17 = vrot.lane.b32.xlu0 %v16_v4, %s41_s9 }
  0x7c   :  { %v12_v5 = vpop.permute.xlu0 %11  }
  0x7d   :  { %v24_v6 = vpop.permute.xlu1 %23   ;;  %15 = vst.msk [vmem:[#allocation0 + $0x1] sm:$0x1] %vm8_vm0, %v12_v5  }
  0x7e   :  { %27 = vst.msk [vmem:[#allocation0 + $0x3] sm:$0x1] %vm8_vm0, %v24_v6  }
  0x80   :  { %v18_v7 = vpop.permute.xlu0 %17  }
  0x81   :  { %21 = vst.msk [vmem:[#allocation0 + $0x2] sm:$0x1] %vm8_vm0, %v18_v7  }
  0x88   :  { %v32_v8 = vld [vmem:[#allocation0] sm:$0xf] }
  0x89   :  { %35 = vst [vmem:[%s59_s1] sm:$0xf] %v32_v8 }

// kernel: decoder_block.4
= control target key start
LH: loop header
LB: loop body
LE: loop exit
PB: predicated region body
PF: predicated region fallthrough
CT: control target
= control target key end

     0   :  { %v243_v3 = vmov 0.0   ;;  %vm17_vm0 = vcmask 64512   ;;  %vm104_vm1 = vcmask 1041408   ;;  %vm220_vm2 = vcmask 1024   ;;  %s304_s0 = inlined_call_operand.vmem [shape: f32[2,8,256], index: 0, kind: input, shape index: {}]   ;;  %s305_s1 = inlined_call_operand.vmem [shape: f32[2,8], index: 1, kind: input, shape index: {}]   ;;  %s306_s2 = inlined_call_operand.vmem [shape: f32[2,2,256], index: 2, kind: output, shape index: {0}]   ;;  %s307_s3 = inlined_call_operand.vmem [shape: f32[1,2,1], index: 3, kind: output, shape index: {1}]   ;;  %s308_s4 = inlined_call_operand.vmem [shape: f32[1,2,1], index: 4, kind: output, shape index: {2}]  }
   0x1   :  { %v16_v0 = vld [vmem:[%s304_s0 + $0x8] sm:$0xff]  ;;  %v238_v1 = vld [vmem:[%s304_s0 + $0x18] sm:$0xff]  ;;  %v15_v2 = vld [vmem:[%s304_s0] sm:$0xff]  ;;  %85 = vmatprep.mubr.f32.mxu0 %v243_v3  ;;  %186 = vmatprep.mubr.f32.mxu1 %v243_v3 }
   0x2   :  { %51 = vmatprep.subr.mxu0 %v16_v0  ;;  %152 = vmatprep.subr.mxu1 %v238_v1  ;;  %v237_v4 = vld [vmem:[%s304_s0 + $0x10] sm:$0xff]  ;;  %v14_v5 = vld [vmem:[%s305_s1] sm:$0x3] }
   0x3   :  { %52 = vmatpush1.msra.mxu0 %v15_v2  ;;  %153 = vmatpush1.msra.mxu1 %v237_v4 }
   0x4   :  { %235 = vmatmul.mubr.msk.f32.vlgmr.msra.gmra.mxu0 %vm17_vm0, %v14_v5  ;;  %239 = vmatmul.mubr.msk.f32.vlgmr.msra.gmra.mxu1 %vm17_vm0, %v14_v5 }
  0xc4   :  { %v87_v6 = vpop.f32.mrf.mxu0  ;;  %v188_v7 = vpop.f32.mrf.mxu1 }
  0xc5   :  { %v111_v8 = vmul.f32 %v87_v6, %v87_v6  ;;  %v212_v9 = vmul.f32 %v188_v7, %v188_v7  ;;  %v206_v16 = vsel %vm104_vm1, %v188_v7, 0.0  ;;  %v105_v18 = vsel %vm104_vm1, %v87_v6, 0.0 }
  0xc6   :  { %v89_v10 = vpop.f32.mrf.mxu0  ;;  %v190_v11 = vpop.f32.mrf.mxu1 }
  0xc7   :  { %v94_v12 = vcombine.low %v87_v6, %v89_v10  ;;  %v112_v13 = vmul.f32 %v89_v10, %v89_v10  ;;  %v195_v14 = vcombine.low %v188_v7, %v190_v11  ;;  %v213_v15 = vmul.f32 %v190_v11, %v190_v11 }
  0xc8   :  { %v207_v17 = vsel %vm104_vm1, %v190_v11, 0.0  ;;  %v106_v19 = vsel %vm104_vm1, %v89_v10, 0.0  ;;  %v214_v24 = vsel %vm104_vm1, %v212_v9, 0.0  ;;  %v113_v25 = vsel %vm104_vm1, %v111_v8, 0.0 }
  0xc9   :  { %236 = vst.sshfl [vmem:[%s306_s2] sm:$0x33 pattern:$0x76325410] %v94_v12  ;;  %v208_v20 = vadd.f32 %v207_v17, %v206_v16  ;;  %v107_v21 = vadd.f32 %v106_v19, %v105_v18  ;;  %v215_v22 = vsel %vm104_vm1, %v213_v15, 0.0  ;;  %v114_v23 = vsel %vm104_vm1, %v112_v13, 0.0 }
  0xca   :  { %241 = vst.sshfl [vmem:[%s306_s2 + $0x4] sm:$0x33 pattern:$0x76325410] %v195_v14  ;;  %v216_v26 = vadd.f32 %v215_v22, %v214_v24  ;;  %v115_v27 = vadd.f32 %v114_v23, %v113_v25 }
  0xcb   :  { %209 = vadd.xlane.f32.xlu1 %v208_v20  ;;  %108 = vadd.xlane.f32.xlu0 %v107_v21 }
  0xcf   :  { %217 = vadd.xlane.f32.xlu1 %v216_v26  ;;  %116 = vadd.xlane.f32.xlu0 %v115_v27 }
 0x154   :  { %v210_v28 = vpop.xlane.xlu1 %209  ;;  %v109_v29 = vpop.xlane.xlu0 %108 }
 0x155   :  { %v211_v30 = vadd.f32 %v210_v28, %v109_v29 }
 0x157   :  { %221 = vst.msk [vmem:[%s307_s3] sm:$0x3] %vm220_vm2, %v211_v30 }
 0x158   :  { %v218_v31 = vpop.xlane.xlu1 %217  ;;  %v117_v32 = vpop.xlane.xlu0 %116 }
 0x159   :  { %v219_v33 = vadd.f32 %v218_v31, %v117_v32 }
 0x15b   :  { %222 = vst.msk [vmem:[%s308_s4] sm:$0x3] %vm220_vm2, %v219_v33 }

// kernel: tile.42
= control target key start
LH: loop header
LB: loop body
LE: loop exit
PB: predicated region body
PF: predicated region fallthrough
CT: control target
= control target key end

     0   :  { %s22_s0 = inlined_call_operand.vmem [shape: f32[4], index: 0, kind: input, shape index: {}]   ;;  %s23_s1 = inlined_call_operand.vmem [shape: f32[4,4], index: 1, kind: output, shape index: {}]  }
   0x1   :  { %v4_v0 = vld [vmem:[%s22_s0] ss:$0 sm:$0xff] }
   0x2   :  { %5 = vst [vmem:[%s23_s1] sm:$0xf] %v4_v0 }

// kernel: tile.2
= control target key start
LH: loop header
LB: loop body
LE: loop exit
PB: predicated region body
PF: predicated region fallthrough
CT: control target
= control target key end

     0   :  { %s35_s8 = smov 125   ;;  %vm8_vm0 = vcmask 7168   ;;  %s36_s11 = smov 126   ;;  %s62_s0 = inlined_call_operand.vmem [shape: f32[4,4], index: 0, kind: input, shape index: {}]   ;;  %s63_s1 = inlined_call_operand.vmem [shape: f32[16,1], index: 1, kind: output, shape index: {}]  }
   0x1   :  { %v5_v0 = vld [vmem:[%s62_s0] sm:$0xf]  ;;  %s34_s0 = smov 127  }
   0x2   :  { %6 = vst [vmem:[#allocation0] sm:$0xf] %v5_v0 }
   0x9   :  { %v10_v1 = vld [vmem:[#allocation0] sm:$0xf]  }
   0xa   :  { %v22_v2 = vld [vmem:[#allocation0] sm:$0xf]   ;;  %11 = vrot.lane.b32.xlu0 %v10_v1, %s34_s0 }
   0xb   :  { %23 = vrot.lane.b32.xlu1 %v22_v2, %s35_s8  ;;  %v7_v3 = vld [vmem:[#allocation0] sm:$0xf]  }
   0xc   :  { %v16_v4 = vld [vmem:[#allocation0] sm:$0xf]   ;;  %9 = vst.msk [vmem:[%s63_s1] ss:$4 sm:$0xf] %vm8_vm0, %v7_v3  }
   0xe   :  { %17 = vrot.lane.b32.xlu0 %v16_v4, %s36_s11 }
  0x7c   :  { %v12_v5 = vpop.permute.xlu0 %11  }
  0x7d   :  { %v24_v6 = vpop.permute.xlu1 %23   ;;  %28 = vst.msk [vmem:[%s63_s1 + $0x1] ss:$4 sm:$0xf] %vm8_vm0, %v12_v5  }
  0x7e   :  { %30 = vst.msk [vmem:[%s63_s1 + $0x3] ss:$4 sm:$0xf] %vm8_vm0, %v24_v6  }
  0x80   :  { %v18_v7 = vpop.permute.xlu0 %17  }
  0x81   :  { %29 = vst.msk [vmem:[%s63_s1 + $0x2] ss:$4 sm:$0xf] %vm8_vm0, %v18_v7  }

// kernel: decoder_block.6
= control target key start
LH: loop header
LB: loop body
LE: loop exit
PB: predicated region body
PF: predicated region fallthrough
CT: control target
= control target key end

     0   :  { %v291_v0 = vmov 0   ;;  %v292_v3 = vmov 0.0   ;;  %vm42_vm0 = vcmask 64512   ;;  %vm261_vm1 = vcmask 7168   ;;  %s392_s2 = inlined_call_operand.vmem [shape: f32[8,1], index: 2, kind: input, shape index: {}]   ;;  %s393_s3 = inlined_call_operand.vmem [shape: f32[8,1], index: 3, kind: input, shape index: {}]   ;;  %s394_s0 = inlined_call_operand.vmem [shape: f32[2,8,256], index: 0, kind: input, shape index: {}]   ;;  %s395_s1 = inlined_call_operand.vmem [shape: f32[16,8], index: 1, kind: input, shape index: {}]   ;;  %s396_s4 = inlined_call_operand.vmem [shape: f32[2,16,256], index: 4, kind: output, shape index: {0}]   ;;  %s397_s5 = inlined_call_operand.vmem [shape: f32[1,16,1], index: 5, kind: output, shape index: {1}]   ;;  %s398_s6 = inlined_call_operand.vmem [shape: f32[1,16,1], index: 6, kind: output, shape index: {2}]  }
   0x1   :  { %290 = vset.pattern.permute.xlu0 %v291_v0  ;;  %v22_v1 = vld [vmem:[%s392_s2] sm:$0xff]  ;;  %113 = vmatprep.mubr.f32.mxu0 %v292_v3  ;;  %v25_v4 = vld [vmem:[%s394_s0 + $0x8] sm:$0xff]  ;;  %v281_v6 = vld [vmem:[%s394_s0 + $0x18] sm:$0xff] }
   0x2   :  { %28 = vperm.xlu0 %290, %v22_v1   ;;  %v23_v2 = vld [vmem:[%s393_s3] sm:$0xff]  ;;  %223 = vmatprep.mubr.f32.mxu1 %v292_v3  ;;  %v280_v8 = vld [vmem:[%s394_s0 + $0x10] sm:$0xff]  ;;  %v21_v23 = vld [vmem:[%s395_s1 + $0x8] sm:$0xff] }
   0x3   :  { %v24_v7 = vld [vmem:[%s394_s0] sm:$0xff] }
   0x4   :  { %v20_v22 = vld [vmem:[%s395_s1] sm:$0xff] }
   0x6   :  { %35 = vperm.xlu0 %290, %v23_v2  }
  0x7d   :  { %v29_v5 = vpop.permute.xlu0 %28 }
  0x7e   :  { %v32_v9 = vmul.f32 %v29_v5, %v25_v4  ;;  %v154_v10 = vmul.f32 %v281_v6, %v29_v5  ;;  %v31_v11 = vmul.f32 %v29_v5, %v24_v7  ;;  %v153_v12 = vmul.f32 %v280_v8, %v29_v5 }
  0x81   :  { %v36_v13 = vpop.permute.xlu0 %35 }
  0x82   :  { %v39_v14 = vadd.f32 %v36_v13, %v32_v9  ;;  %v156_v15 = vadd.f32 %v154_v10, %v36_v13  ;;  %v38_v16 = vadd.f32 %v36_v13, %v31_v11  ;;  %v155_v17 = vadd.f32 %v153_v12, %v36_v13 }
  0x84   :  { %v41_v18 = vmax.f32 %v39_v14, 0.0  ;;  %v158_v19 = vmax.f32 %v156_v15, 0.0  ;;  %v40_v20 = vmax.f32 %v38_v16, 0.0  ;;  %v157_v21 = vmax.f32 %v155_v17, 0.0 }
  0x86   :  { %79 = vmatprep.subr.mxu0 %v41_v18  ;;  %189 = vmatprep.subr.mxu1 %v158_v19 }
  0x87   :  { %80 = vmatpush1.msra.mxu0 %v40_v20  ;;  %190 = vmatpush1.msra.mxu1 %v157_v21 }
  0x88   :  { %278 = vmatmul.mubr.msk.f32.vlgmr.msra.gmra.mxu0 %vm42_vm0, %v20_v22  ;;  %282 = vmatmul.mubr.msk.f32.vlgmr.msra.gmra.mxu1 %vm42_vm0, %v20_v22 }
  0x89   :  { %119 = vmatprep.mubr.f32.mxu0 %v292_v3  ;;  %229 = vmatprep.mubr.f32.mxu1 %v292_v3 }
  0x8c   :  { %279 = vmatmul.mubr.msk.f32.gmra.mxu0 %vm42_vm0, %v21_v23  ;;  %283 = vmatmul.mubr.msk.f32.gmra.mxu1 %vm42_vm0, %v21_v23 }
 0x148   :  { %v115_v24 = vpop.f32.mrf.mxu0  ;;  %v225_v25 = vpop.f32.mrf.mxu1 }
 0x149   :  { %126 = vst [vmem:[%s396_s4] sm:$0xff] %v115_v24  ;;  %284 = vst [vmem:[%s396_s4 + $0x20] sm:$0xff] %v225_v25  ;;  %v138_v29 = vmul.f32 %v115_v24, %v115_v24  ;;  %v249_v37 = vmul.f32 %v225_v25, %v225_v25 }
 0x14a   :  { %v117_v26 = vpop.f32.mrf.mxu0  ;;  %v227_v27 = vpop.f32.mrf.mxu1 }
 0x14b   :  { %127 = vst [vmem:[%s396_s4 + $0x8] sm:$0xff] %v117_v26  ;;  %285 = vst [vmem:[%s396_s4 + $0x28] sm:$0xff] %v227_v27  ;;  %v130_v28 = vadd.f32 %v117_v26, %v115_v24  ;;  %v139_v30 = vmul.f32 %v117_v26, %v117_v26  ;;  %v241_v36 = vadd.f32 %v227_v27, %v225_v25 }
 0x14c   :  { %v121_v31 = vpop.f32.mrf.mxu0  ;;  %v231_v32 = vpop.f32.mrf.mxu1  ;;  %v250_v38 = vmul.f32 %v227_v27, %v227_v27 }
 0x14d   :  { %131 = vadd.xlane.f32.xlu1 %v130_v28  ;;  %v142_v33 = vadd.f32 %v139_v30, %v138_v29  ;;  %128 = vst [vmem:[%s396_s4 + $0x10] sm:$0xff] %v121_v31  ;;  %286 = vst [vmem:[%s396_s4 + $0x30] sm:$0xff] %v231_v32  ;;  %v140_v43 = vmul.f32 %v121_v31, %v121_v31  ;;  %v251_v46 = vmul.f32 %v231_v32, %v231_v32 }
 0x14e   :  { %v123_v34 = vpop.f32.mrf.mxu0  ;;  %v233_v35 = vpop.f32.mrf.mxu1  ;;  %v253_v39 = vadd.f32 %v250_v38, %v249_v37 }
 0x14f   :  { %143 = vadd.xlane.f32.xlu0 %v142_v33  ;;  %129 = vst [vmem:[%s396_s4 + $0x18] sm:$0xff] %v123_v34  ;;  %287 = vst [vmem:[%s396_s4 + $0x38] sm:$0xff] %v233_v35  ;;  %v133_v40 = vadd.f32 %v123_v34, %v121_v31  ;;  %v141_v41 = vmul.f32 %v123_v34, %v123_v34  ;;  %v244_v42 = vadd.f32 %v233_v35, %v231_v32 }
 0x150   :  { %v252_v44 = vmul.f32 %v233_v35, %v233_v35 }
 0x151   :  { %242 = vadd.xlane.f32.xlu1 %v241_v36  ;;  %v145_v45 = vadd.f32 %v141_v41, %v140_v43 }
 0x152   :  { %v256_v47 = vadd.f32 %v252_v44, %v251_v46 }
 0x155   :  { %254 = vadd.xlane.f32.xlu1 %v253_v39 }
 0x159   :  { %134 = vadd.xlane.f32.xlu1 %v133_v40 }
 0x15d   :  { %245 = vadd.xlane.f32.xlu1 %v244_v42 }
 0x161   :  { %146 = vadd.xlane.f32.xlu1 %v145_v45 }
 0x165   :  { %257 = vadd.xlane.f32.xlu1 %v256_v47 }
 0x1d6   :  { %v132_v48 = vpop.xlane.xlu1 %131 }
 0x1d8   :  { %v144_v51 = vpop.xlane.xlu0 %143 }
 0x1da   :  { %v243_v49 = vpop.xlane.xlu1 %242 }
 0x1db   :  { %v247_v50 = vadd.f32 %v243_v49, %v132_v48 }
 0x1dd   :  { %262 = vst.msk [vmem:[%s397_s5] sm:$0xff] %vm261_vm1, %v247_v50 }
 0x1de   :  { %v255_v52 = vpop.xlane.xlu1 %254 }
 0x1df   :  { %v259_v53 = vadd.f32 %v255_v52, %v144_v51 }
 0x1e1   :  { %264 = vst.msk [vmem:[%s398_s6] sm:$0xff] %vm261_vm1, %v259_v53 }
 0x1e2   :  { %v135_v54 = vpop.xlane.xlu1 %134 }
 0x1e6   :  { %v246_v55 = vpop.xlane.xlu1 %245 }
 0x1e7   :  { %v248_v56 = vadd.f32 %v246_v55, %v135_v54 }
 0x1e9   :  { %263 = vst.msk [vmem:[%s397_s5 + $0x8] sm:$0xff] %vm261_vm1, %v248_v56 }
 0x1ea   :  { %v147_v57 = vpop.xlane.xlu1 %146 }
 0x1ee   :  { %v258_v58 = vpop.xlane.xlu1 %257 }
 0x1ef   :  { %v260_v59 = vadd.f32 %v258_v58, %v147_v57 }
 0x1f1   :  { %265 = vst.msk [vmem:[%s398_s6 + $0x8] sm:$0xff] %vm261_vm1, %v260_v59 }

// kernel: decoder_block.7
= control target key start
LH: loop header
LB: loop body
LE: loop exit
PB: predicated region body
PF: predicated region fallthrough
CT: control target
= control target key end

     0   :  { %v85_v0 = vmov 0   ;;  %s166_s2 = inlined_call_operand.vmem [shape: f32[16,1], index: 2, kind: input, shape index: {}]   ;;  %s167_s1 = inlined_call_operand.vmem [shape: f32[16,1], index: 1, kind: input, shape index: {}]   ;;  %s168_s0 = inlined_call_operand.vmem [shape: f32[2,16,256], index: 0, kind: input, shape index: {}]   ;;  %s169_s3 = inlined_call_operand.vmem [shape: f32[2,16,256], index: 3, kind: output, shape index: {}]  }
   0x1   :  { %84 = vset.pattern.permute.xlu1 %v85_v0  ;;  %83 = vset.pattern.permute.xlu0 %v85_v0  ;;  %v42_v1 = vld [vmem:[%s166_s2] sm:$0xff]  ;;  %v43_v3 = vld [vmem:[%s166_s2 + $0x8] sm:$0xff]  ;;  %v16_v15 = vld [vmem:[%s168_s0 + $0x10] sm:$0xff] }
   0x2   :  { %v22_v2 = vld [vmem:[%s167_s1] sm:$0xff]  ;;  %46 = vperm.xlu1 %84, %v42_v1   ;;  %v23_v4 = vld [vmem:[%s167_s1 + $0x8] sm:$0xff]  ;;  %v17_v20 = vld [vmem:[%s168_s0 + $0x18] sm:$0xff] }
   0x3   :  { %26 = vperm.xlu0 %83, %v22_v2   ;;  %v14_v5 = vld [vmem:[%s168_s0] sm:$0xff]  ;;  %v15_v6 = vld [vmem:[%s168_s0 + $0x8] sm:$0xff]  ;;  %v20_v21 = vld [vmem:[%s168_s0 + $0x30] sm:$0xff] }
   0x4   :  { %v18_v7 = vld [vmem:[%s168_s0 + $0x20] sm:$0xff]  ;;  %v19_v8 = vld [vmem:[%s168_s0 + $0x28] sm:$0xff]  ;;  %v21_v22 = vld [vmem:[%s168_s0 + $0x38] sm:$0xff] }
   0x6   :  { %51 = vperm.xlu1 %84, %v43_v3  }
   0x7   :  { %31 = vperm.xlu0 %83, %v23_v4  }
  0x7d   :  { %v47_v10 = vpop.permute.xlu1 %46 }
  0x7e   :  { %v27_v9 = vpop.permute.xlu0 %26 }
  0x7f   :  { %v34_v11 = vmul.f32 %v27_v9, %v14_v5  ;;  %v35_v12 = vmul.f32 %v27_v9, %v15_v6  ;;  %v38_v13 = vmul.f32 %v27_v9, %v18_v7  ;;  %v39_v14 = vmul.f32 %v27_v9, %v19_v8 }
  0x81   :  { %v54_v16 = vadd.f32 %v47_v10, %v34_v11  ;;  %v55_v17 = vadd.f32 %v47_v10, %v35_v12  ;;  %v58_v18 = vadd.f32 %v47_v10, %v38_v13  ;;  %v59_v19 = vadd.f32 %v47_v10, %v39_v14  ;;  %v52_v32 = vpop.permute.xlu1 %51 }
  0x82   :  { %v32_v23 = vpop.permute.xlu0 %31 }
  0x83   :  { %v62_v24 = vmax.f32 %v54_v16, 0.0  ;;  %v63_v25 = vmax.f32 %v55_v17, 0.0  ;;  %v66_v26 = vmax.f32 %v58_v18, 0.0  ;;  %v67_v27 = vmax.f32 %v59_v19, 0.0 }
  0x84   :  { %v36_v28 = vmul.f32 %v32_v23, %v16_v15  ;;  %v37_v29 = vmul.f32 %v32_v23, %v17_v20  ;;  %v40_v30 = vmul.f32 %v32_v23, %v20_v21  ;;  %v41_v31 = vmul.f32 %v32_v23, %v21_v22 }
  0x85   :  { %70 = vst [vmem:[%s169_s3] sm:$0xff] %v62_v24  ;;  %71 = vst [vmem:[%s169_s3 + $0x8] sm:$0xff] %v63_v25 }
  0x86   :  { %74 = vst [vmem:[%s169_s3 + $0x20] sm:$0xff] %v66_v26  ;;  %75 = vst [vmem:[%s169_s3 + $0x28] sm:$0xff] %v67_v27  ;;  %v56_v33 = vadd.f32 %v52_v32, %v36_v28  ;;  %v57_v34 = vadd.f32 %v52_v32, %v37_v29  ;;  %v60_v35 = vadd.f32 %v52_v32, %v40_v30 }
  0x87   :  { %v61_v36 = vadd.f32 %v52_v32, %v41_v31 }
  0x88   :  { %v64_v37 = vmax.f32 %v56_v33, 0.0  ;;  %v65_v38 = vmax.f32 %v57_v34, 0.0  ;;  %v68_v39 = vmax.f32 %v60_v35, 0.0 }
  0x89   :  { %v69_v40 = vmax.f32 %v61_v36, 0.0 }
  0x8a   :  { %72 = vst [vmem:[%s169_s3 + $0x10] sm:$0xff] %v64_v37  ;;  %73 = vst [vmem:[%s169_s3 + $0x18] sm:$0xff] %v65_v38 }
  0x8b   :  { %76 = vst [vmem:[%s169_s3 + $0x30] sm:$0xff] %v68_v39  ;;  %77 = vst [vmem:[%s169_s3 + $0x38] sm:$0xff] %v69_v40 }

// kernel: decoder_block.5
= control target key start
LH: loop header
LB: loop body
LE: loop exit
PB: predicated region body
PF: predicated region fallthrough
CT: control target
= control target key end

     0   :  { %v886_v0 = vmov 0   ;;  %v26_v3 = vlaneseq  ;;  %v887_v4 = vmov 269488144   ;;  %v888_v9 = vmov 1983009808   ;;  %s890_s27 = smov 112   ;;  %s1070_s2 = inlined_call_operand.vmem [shape: f32[2,1], index: 2, kind: input, shape index: {}]   ;;  %s1071_s3 = inlined_call_operand.vmem [shape: f32[2,1], index: 3, kind: input, shape index: {}]   ;;  %s1072_s0 = inlined_call_operand.vmem [shape: f32[2,2,256], index: 0, kind: input, shape index: {}]   ;;  %s1073_s1 = inlined_call_operand.vmem [shape: f32[4,8,2], index: 1, kind: input, shape index: {}]   ;;  %s1074_s4 = inlined_call_operand.vmem [shape: f32[2,8,256], index: 4, kind: output, shape index: {0}]   ;;  %s1075_s5 = inlined_call_operand.vmem [shape: f32[1,8,1], index: 5, kind: output, shape index: {1}]   ;;  %s1076_s6 = inlined_call_operand.vmem [shape: f32[1,8,1], index: 6, kind: output, shape index: {2}]  }
   0x1   :  { %885 = vset.pattern.permute.xlu0 %v886_v0  ;;  %v24_v1 = vld [vmem:[%s1070_s2] sm:$0x3]  ;;  %v65_v5 = vunpack.c.l.s4 %v887_v4  ;;  %v89_v10 = vunpack.c.l.s4 %v888_v9  ;;  %v863_v18 = vld [vmem:[%s1072_s0 + $0x4] sm:$0xf]  ;;  %v889_v23 = vmov 0.0   ;;  %vm141_vm0 = vcmask 1041408  }
   0x2   :  { %62 = vperm.xlu0 %885, %v24_v1   ;;  %v25_v2 = vld [vmem:[%s1071_s3] sm:$0x3]  ;;  %v68_v7 = vshrl.u32 %v26_v3, 7  ;;  %212 = vmatprep.mubr.f32.mxu0 %v889_v23  ;;  %s891_s28 = smov 127   ;;  %s892_s30 = smov 111   ;;  %vm137_vm1 = vcmask 15360  }
   0x3   :  { %v66_v6 = vunpack.c.0.s8 %v65_v5  ;;  %v59_v13 = vld [vmem:[%s1072_s0] sm:$0xf]  ;;  %v90_v14 = vunpack.c.0.s8 %v89_v10  ;;  %290 = vmatprep.mubr.f32.mxu1 %v889_v23  ;;  %v952_v31 = vand.u32 127, %v26_v3  ;;  %v21_v45 = vld [vmem:[%s1073_s1 + $0x8] sm:$0xff]  ;;  %v22_v49 = vld [vmem:[%s1073_s1 + $0x10] sm:$0xff]  ;;  %vm836_vm9 = vcmask 7168  }
   0x4   :  { %v946_v28 = vld [vmem:[%s1073_s1] sm:$0xff]  ;;  %v23_v58 = vld [vmem:[%s1073_s1 + $0x18] sm:$0xff] }
   0x5   :  { %v69_v8 = vsub.s32 %v66_v6, %v68_v7  ;;  %v93_v19 = vsub.s32 %v90_v14, %v68_v7  ;;  %v28_v32 = vadd.s32 128, %v952_v31  ;;  %v33_v34 = vand.u32 15, %v952_v31 }
   0x6   :  { %75 = vperm.xlu0 %885, %v25_v2   ;;  %vm102_vm2 = vcmp.lt.s32.totalorder %v952_v31, 127  ;;  %vm115_vm5 = vcmp.lt.s32.totalorder %v952_v31, 112  ;;  %vm128_vm7 = vcmp.lt.s32.totalorder %v952_v31, 111 }
   0x7   :  { %v40_v33 = vand.u32 15, %v28_v32  ;;  %vm961_vm4 = vcmp.ne.s32.totalorder %v33_v34, 15  ;;  %vm56_vm6 = vcmp.lt.s32.totalorder %v28_v32, 240 }
   0x9   :  { %vm957_vm3 = vcmp.ne.s32.totalorder %v40_v33, 15 }
   0xa   :  { %vm994_vm8 = vmand %vm957_vm3, %vm56_vm6 }
  0x7d   :  { %v63_v11 = vpop.permute.xlu0 %62 }
  0x7e   :  { %v70_v12 = vrot.slane %v63_v11, %v69_v8 }
  0x80   :  { %v72_v16 = vmul.f32 %v70_v12, %v59_v13  ;;  %v475_v21 = vmul.f32 %v863_v18, %v70_v12 }
  0x81   :  { %v76_v15 = vpop.permute.xlu0 %75 }
  0x82   :  { %v83_v17 = vrot.slane %v76_v15, %v69_v8 }
  0x84   :  { %v85_v20 = vadd.f32 %v83_v17, %v72_v16  ;;  %v476_v25 = vadd.f32 %v475_v21, %v83_v17 }
  0x86   :  { %v86_v22 = vmax.f32 %v85_v20, 0.0  ;;  %v477_v27 = vmax.f32 %v476_v25, 0.0 }
  0x88   :  { %v94_v24 = vrot.slane %v86_v22, %v93_v19  ;;  %v485_v29 = vrot.slane %v477_v27, %v93_v19 }
  0x8a   :  { %111 = vrot.lane.b32.xlu0 %v94_v24, %s890_s27  ;;  %98 = vrot.lane.b32.xlu1 %v94_v24, %s891_s28  ;;  %v95_v26 = vcombine.high %v94_v24, %v94_v24  ;;  %v486_v30 = vcombine.high %v485_v29, %v485_v29 }
  0x8c   :  { %854 = vmatprep.subr.msk.mxu1 %vm141_vm0, %v95_v26 }
  0x8d   :  { %855 = vmatpush1.msk.msra.mxu1 %vm141_vm0, %v94_v24 }
  0x8e   :  { %124 = vrot.lane.b32.xlu0 %v94_v24, %s892_s30  ;;  %100 = vrot.lane.b32.xlu1 %v95_v26, %s891_s28 }
  0x8f   :  { %856 = vmatmul.mubr.msk.f32.vlgmr.msra.gmra.mxu1 %vm137_vm1, %v946_v28 }
  0x90   :  { %452 = vmatprep.mubr.f32.mxu1 %v889_v23 }
  0x92   :  { %489 = vrot.lane.b32.xlu0 %v485_v29, %s891_s28  ;;  %113 = vrot.lane.b32.xlu1 %v95_v26, %s890_s27 }
  0x96   :  { %497 = vrot.lane.b32.xlu0 %v485_v29, %s890_s27  ;;  %126 = vrot.lane.b32.xlu1 %v95_v26, %s892_s30 }
  0x9a   :  { %505 = vrot.lane.b32.xlu0 %v485_v29, %s892_s30  ;;  %491 = vrot.lane.b32.xlu1 %v486_v30, %s891_s28 }
  0x9e   :  { %499 = vrot.lane.b32.xlu1 %v486_v30, %s890_s27 }
  0xa2   :  { %507 = vrot.lane.b32.xlu1 %v486_v30, %s892_s30 }
  0xfc   :  { %v112_v35 = vpop.permute.xlu0 %111  ;;  %v99_v36 = vpop.permute.xlu1 %98 }
 0x100   :  { %v101_v39 = vpop.permute.xlu1 %100  ;;  %v125_v42 = vpop.permute.xlu0 %124 }
 0x101   :  { %v103_v40 = vsel %vm102_vm2, %v99_v36, %v101_v39  ;;  %v104_v41 = vsel %vm102_vm2, %v101_v39, %v99_v36 }
 0x102   :  { %v110_v43 = vsel %vm957_vm3, %v104_v41, 0.0  ;;  %v109_v44 = vsel %vm961_vm4, %v103_v40, 0.0 }
 0x103   :  { %851 = vmatprep.subr.msk.mxu0 %vm141_vm0, %v110_v43 }
 0x104   :  { %852 = vmatpush1.msk.msra.mxu0 %vm141_vm0, %v109_v44  ;;  %v114_v46 = vpop.permute.xlu1 %113  ;;  %v490_v52 = vpop.permute.xlu0 %489 }
 0x105   :  { %v117_v47 = vsel %vm115_vm5, %v114_v46, %v112_v35  ;;  %853 = vmatmul.mubr.msk.f32.vlgmr.msra.gmra.mxu0 %vm137_vm1, %v21_v45  ;;  %v116_v50 = vsel %vm115_vm5, %v112_v35, %v114_v46 }
 0x106   :  { %v123_v48 = vsel %vm56_vm6, %v117_v47, 0.0  ;;  %370 = vmatprep.mubr.f32.mxu0 %v889_v23 }
 0x107   :  { %857 = vmatprep.subr.msk.mxu0 %vm141_vm0, %v123_v48 }
 0x108   :  { %858 = vmatpush1.msk.msra.mxu0 %vm141_vm0, %v116_v50  ;;  %v127_v53 = vpop.permute.xlu1 %126  ;;  %v498_v62 = vpop.permute.xlu0 %497 }
 0x109   :  { %v129_v54 = vsel %vm128_vm7, %v125_v42, %v127_v53  ;;  %v130_v55 = vsel %vm128_vm7, %v127_v53, %v125_v42  ;;  %859 = vmatmul.mubr.msk.f32.vlgmr.msra.gmra.mxu0 %vm137_vm1, %v22_v49 }
 0x10a   :  { %v135_v56 = vsel %vm961_vm4, %v129_v54, 0.0  ;;  %v136_v57 = vsel %vm994_vm8, %v130_v55, 0.0  ;;  %583 = vmatprep.mubr.f32.mxu0 %v889_v23 }
 0x10b   :  { %860 = vmatprep.subr.msk.mxu1 %vm141_vm0, %v136_v57 }
 0x10c   :  { %v492_v59 = vpop.permute.xlu1 %491  ;;  %861 = vmatpush1.msk.msra.mxu1 %vm141_vm0, %v135_v56  ;;  %v506_v5 = vpop.permute.xlu0 %505 }
 0x10d   :  { %v493_v60 = vsel %vm102_vm2, %v490_v52, %v492_v59  ;;  %v494_v61 = vsel %vm102_vm2, %v492_v59, %v490_v52  ;;  %867 = vmatprep.subr.msk.mxu1 %vm141_vm0, %v486_v30  ;;  %862 = vmatmul.mubr.msk.f32.vlgmr.msra.gmra.mxu1 %vm137_vm1, %v23_v58 }
 0x10e   :  { %v495_v63 = vsel %vm961_vm4, %v493_v60, 0.0  ;;  %v496_v0 = vsel %vm957_vm3, %v494_v61, 0.0  ;;  %868 = vmatpush1.msk.msra.mxu1 %vm141_vm0, %v485_v29  ;;  %658 = vmatprep.mubr.f32.mxu1 %v889_v23 }
 0x10f   :  { %864 = vmatprep.subr.msk.mxu0 %vm141_vm0, %v496_v0 }
 0x110   :  { %865 = vmatpush1.msk.msra.mxu0 %vm141_vm0, %v495_v63  ;;  %v500_v1 = vpop.permute.xlu1 %499 }
 0x111   :  { %v502_v2 = vsel %vm115_vm5, %v500_v1, %v498_v62  ;;  %866 = vmatmul.mubr.msk.f32.vlgmr.msra.gmra.mxu0 %vm137_vm1, %v21_v45  ;;  %869 = vmatmul.mubr.msk.f32.vlgmr.msra.gmra.mxu1 %vm137_vm1, %v946_v28  ;;  %v501_v4 = vsel %vm115_vm5, %v498_v62, %v500_v1 }
 0x112   :  { %v504_v3 = vsel %vm56_vm6, %v502_v2, 0.0  ;;  %735 = vmatprep.mubr.f32.mxu0 %v889_v23  ;;  %814 = vmatprep.mubr.f32.mxu1 %v889_v23 }
 0x113   :  { %870 = vmatprep.subr.msk.mxu0 %vm141_vm0, %v504_v3 }
 0x114   :  { %871 = vmatpush1.msk.msra.mxu0 %vm141_vm0, %v501_v4  ;;  %v508_v6 = vpop.permute.xlu1 %507 }
 0x115   :  { %v509_v7 = vsel %vm128_vm7, %v506_v5, %v508_v6  ;;  %v510_v8 = vsel %vm128_vm7, %v508_v6, %v506_v5  ;;  %872 = vmatmul.mubr.msk.f32.vlgmr.msra.gmra.mxu0 %vm137_vm1, %v22_v49 }
 0x116   :  { %v511_v9 = vsel %vm961_vm4, %v509_v7, 0.0  ;;  %v512_v10 = vsel %vm994_vm8, %v510_v8, 0.0 }
 0x117   :  { %873 = vmatprep.subr.msk.mxu1 %vm141_vm0, %v512_v10 }
 0x118   :  { %874 = vmatpush1.msk.msra.mxu1 %vm141_vm0, %v511_v9 }
 0x119   :  { %875 = vmatmul.mubr.msk.f32.vlgmr.msra.gmra.mxu1 %vm137_vm1, %v23_v58 }
 0x14f   :  { %v292_v11 = vpop.f32.mrf.mxu1 }
 0x151   :  { %v294_v13 = vpop.f32.mrf.mxu1 }
 0x1c5   :  { %v214_v12 = vpop.f32.mrf.mxu0 }
 0x1c6   :  { %v293_v14 = vadd.f32 %v292_v11, %v214_v12 }
 0x1c7   :  { %v216_v15 = vpop.f32.mrf.mxu0 }
 0x1c8   :  { %v295_v16 = vadd.f32 %v294_v13, %v216_v15 }
 0x1c9   :  { %v372_v17 = vpop.f32.mrf.mxu0 }
 0x1ca   :  { %v377_v18 = vadd.f32 %v372_v17, %v293_v14 }
 0x1cb   :  { %v374_v19 = vpop.f32.mrf.mxu0 }
 0x1cc   :  { %v378_v20 = vadd.f32 %v374_v19, %v295_v16 }
 0x1cd   :  { %v454_v21 = vpop.f32.mrf.mxu1 }
 0x1ce   :  { %v459_v22 = vadd.f32 %v454_v21, %v377_v18 }
 0x1cf   :  { %v456_v23 = vpop.f32.mrf.mxu1 }
 0x1d0   :  { %461 = vst [vmem:[%s1074_s4] sm:$0xff] %v459_v22  ;;  %v460_v24 = vadd.f32 %v456_v23, %v378_v20  ;;  %v467_v25 = vmul.f32 %v459_v22, %v459_v22 }
 0x1d1   :  { %v585_v26 = vpop.f32.mrf.mxu0  ;;  %v660_v27 = vpop.f32.mrf.mxu1 }
 0x1d2   :  { %462 = vst [vmem:[%s1074_s4 + $0x8] sm:$0xff] %v460_v24  ;;  %v463_v28 = vadd.f32 %v460_v24, %v459_v22  ;;  %v468_v29 = vmul.f32 %v460_v24, %v460_v24  ;;  %v661_v31 = vadd.f32 %v660_v27, %v585_v26 }
 0x1d3   :  { %v587_v30 = vpop.f32.mrf.mxu0  ;;  %v662_v33 = vpop.f32.mrf.mxu1 }
 0x1d4   :  { %464 = vadd.xlane.f32.xlu0 %v463_v28  ;;  %v469_v32 = vadd.f32 %v468_v29, %v467_v25  ;;  %v663_v36 = vadd.f32 %v662_v33, %v587_v30 }
 0x1d5   :  { %v737_v34 = vpop.f32.mrf.mxu0 }
 0x1d6   :  { %470 = vadd.xlane.f32.xlu1 %v469_v32  ;;  %v742_v37 = vadd.f32 %v737_v34, %v661_v31 }
 0x1d7   :  { %v739_v35 = vpop.f32.mrf.mxu0 }
 0x1d8   :  { %v743_v39 = vadd.f32 %v739_v35, %v663_v36 }
 0x1d9   :  { %v816_v38 = vpop.f32.mrf.mxu1 }
 0x1da   :  { %v821_v40 = vadd.f32 %v816_v38, %v742_v37 }
 0x1db   :  { %v818_v41 = vpop.f32.mrf.mxu1 }
 0x1dc   :  { %876 = vst [vmem:[%s1074_s4 + $0x10] sm:$0xff] %v821_v40  ;;  %v822_v42 = vadd.f32 %v818_v41, %v743_v39  ;;  %v830_v45 = vmul.f32 %v821_v40, %v821_v40 }
 0x1de   :  { %877 = vst [vmem:[%s1074_s4 + $0x18] sm:$0xff] %v822_v42  ;;  %v826_v43 = vadd.f32 %v822_v42, %v821_v40  ;;  %v831_v44 = vmul.f32 %v822_v42, %v822_v42 }
 0x1e0   :  { %827 = vadd.xlane.f32.xlu0 %v826_v43  ;;  %v832_v46 = vadd.f32 %v831_v44, %v830_v45 }
 0x1e4   :  { %833 = vadd.xlane.f32.xlu0 %v832_v46 }
 0x25d   :  { %v465_v47 = vpop.xlane.xlu0 %464 }
 0x25f   :  { %v471_v50 = vpop.xlane.xlu1 %470 }
 0x269   :  { %v828_v48 = vpop.xlane.xlu0 %827 }
 0x26a   :  { %v829_v49 = vadd.f32 %v828_v48, %v465_v47 }
 0x26c   :  { %837 = vst.msk [vmem:[%s1075_s5] sm:$0xff] %vm836_vm9, %v829_v49 }
 0x26d   :  { %v834_v51 = vpop.xlane.xlu0 %833 }
 0x26e   :  { %v835_v52 = vadd.f32 %v834_v51, %v471_v50 }
 0x270   :  { %838 = vst.msk [vmem:[%s1076_s6] sm:$0xff] %vm836_vm9, %v835_v52 }

</bundles_post_ra>
